<compile_context>
chip_gen: v7x
topology: tpu7x:2x2x1
jax: 0.10.0
libtpu: 0.0.40
codegen_flags: <defaults>
</compile_context>

<pallas_src>
import functools
import math

import jax
import jax.numpy as jnp
import numpy as np
from jax.experimental import pallas as pl
from jax.experimental.pallas import tpu as pltpu


def _auroc_kernel(c_col_ref, thr_ref, lhs_ref, invp_ref, invn_ref,
                  auc_ref, fpr_ref, tpr_ref,
                  acc_ref, prev_f_ref, prev_t_ref):
    i = pl.program_id(0)              # threshold (lane) stripe index
    k = pl.program_id(1)              # sample (contraction) tile index
    nk = pl.num_programs(1)
    tn = thr_ref.shape[-1]

    @pl.when((i == 0) & (k == 0))
    def _():
        auc_ref[...] = jnp.zeros_like(auc_ref)
        prev_f_ref[...] = jnp.zeros_like(prev_f_ref)
        prev_t_ref[...] = jnp.zeros_like(prev_t_ref)

    @pl.when(k == 0)
    def _():
        acc_ref[...] = jnp.zeros_like(acc_ref)

    # (TM, TN) comparison tile: comp[j, t] = 1 iff score_j >= threshold_t.
    # 0/1 is exact in bf16; the MXU accumulates in f32 (counts exact < 2^24).
    comp = (c_col_ref[...] >= thr_ref[...]).astype(jnp.bfloat16)

    # One fused MXU matmul: LHS row 0 = targets -> TP counts,
    #                       LHS row 1 = ones    -> total "predicted positive" counts.
    acc_ref[...] += jnp.dot(lhs_ref[...], comp, preferred_element_type=jnp.float32)

    @pl.when(k == nk - 1)
    def _():
        counts = acc_ref[...]          # (2, TN) f32
        tps = counts[0:1, :]           # (1, TN)
        fps = counts[1:2, :] - tps     # (1, TN)
        tpr = tps * invp_ref[0]
        fpr = fps * invn_ref[0]

        # Trapezoidal AUC contribution of this stripe; the previous curve point
        # is carried across stripes (the very first previous point is (0, 0)).
        idx = jax.lax.broadcasted_iota(jnp.int32, (1, tn), 1)
        fpr_prev = jnp.where(idx == 0, prev_f_ref[...],
                             pltpu.roll(fpr, shift=1, axis=1))
        tpr_prev = jnp.where(idx == 0, prev_t_ref[...],
                             pltpu.roll(tpr, shift=1, axis=1))
        partial = 0.5 * jnp.sum((fpr - fpr_prev) * (tpr + tpr_prev),
                                axis=1, keepdims=True)
        auc_ref[...] = auc_ref[...] + partial

        # Curve is non-decreasing along the stripe -> last point == per-stripe max.
        prev_f_ref[...] = jnp.max(fpr, axis=1, keepdims=True)
        prev_t_ref[...] = jnp.max(tpr, axis=1, keepdims=True)

        fpr_ref[...] = fpr
        tpr_ref[...] = tpr


@functools.partial(jax.jit, static_argnames=("block_t", "block_m"))
def auroc_forward(confids, target, block_t=512, block_m=512):
    """Returns (auc, fpr, tpr) matching AUROC(ret_curves=True).forward."""
    n = confids.shape[0]
    confids = confids.astype(jnp.float32)
    target = target.astype(jnp.float32)

    # Glue: descending sort of scores / targets (no clean in-kernel sort on TPU).
    order = jnp.argsort(-confids)
    c_sorted = confids[order]
    t_sorted = target[order]

    n_pos = jnp.sum(t_sorted)
    n_neg = n - n_pos
    inv_pos = (1.0 / n_pos).reshape(1).astype(jnp.float32)
    inv_neg = (1.0 / n_neg).reshape(1).astype(jnp.float32)

    # Pad N up to a multiple of the tile sizes, keeping the bounded-VMEM
    # striped/tiled path for any N (never an (N, N) comparison fallback).
    blk = math.lcm(block_t, block_m)
    n_pad = ((n + blk - 1) // blk) * blk
    pad = n_pad - n
    if pad > 0:
        c_min = c_sorted[-1]
        # Padded thresholds = minimum real score -> padded curve points are
        # exactly (1, 1): zero extra trapezoid area, carry stays at (1, 1).
        thr_full = jnp.concatenate([c_sorted, jnp.broadcast_to(c_min, (pad,))])
        # Padded samples = -inf (below every real threshold), target 0 -> they
        # contribute nothing to any count.
        c_full = jnp.concatenate([c_sorted, jnp.full((pad,), -jnp.inf, jnp.float32)])
        t_full = jnp.concatenate([t_sorted, jnp.zeros((pad,), jnp.float32)])
    else:
        thr_full, c_full, t_full = c_sorted, c_sorted, t_sorted

    c_col = c_full.reshape(n_pad, 1)       # samples along sublanes (tiled over k)
    thr_row = thr_full.reshape(1, n_pad)   # thresholds along lanes (striped over i)

    # Fused MXU LHS: row 0 = targets, row 1 = ones. 0/1 exact in bf16.
    lhs = jnp.stack([t_full, jnp.ones_like(t_full)], axis=0).astype(jnp.bfloat16)

    num_stripes = n_pad // block_t
    num_k = n_pad // block_m

    auc, fpr, tpr = pl.pallas_call(
        _auroc_kernel,
        out_shape=(
            jax.ShapeDtypeStruct((1, 1), jnp.float32),
            jax.ShapeDtypeStruct((1, n_pad), jnp.float32),
            jax.ShapeDtypeStruct((1, n_pad), jnp.float32),
        ),
        grid_spec=pltpu.PrefetchScalarGridSpec(
            num_scalar_prefetch=0,
            grid=(num_stripes, num_k),
            in_specs=[
                pl.BlockSpec((block_m, 1), lambda i, k: (k, 0)),    # score column tile
                pl.BlockSpec((1, block_t), lambda i, k: (0, i)),    # threshold stripe
                pl.BlockSpec((2, block_m), lambda i, k: (0, k)),    # [targets; ones] tile
                pl.BlockSpec(memory_space=pltpu.MemorySpace.SMEM),  # 1 / n_pos
                pl.BlockSpec(memory_space=pltpu.MemorySpace.SMEM),  # 1 / n_neg
            ],
            out_specs=[
                pl.BlockSpec((1, 1), lambda i, k: (0, 0)),          # auc (resident acc)
                pl.BlockSpec((1, block_t), lambda i, k: (0, i)),    # fpr stripe
                pl.BlockSpec((1, block_t), lambda i, k: (0, i)),    # tpr stripe
            ],
            scratch_shapes=[
                pltpu.VMEM((2, block_t), jnp.float32),  # [tps; totals] accumulator
                pltpu.VMEM((1, 1), jnp.float32),        # carried fpr of previous point
                pltpu.VMEM((1, 1), jnp.float32),        # carried tpr of previous point
            ],
        ),
        compiler_params=pltpu.CompilerParams(
            dimension_semantics=("arbitrary", "arbitrary"),
        ),
    )(c_col, thr_row, lhs, inv_pos, inv_neg)

    # Glue: drop padded columns, prepend the (0, 0) curve start
    # (as torchmetrics' binary ROC does).
    zero = jnp.zeros((1,), jnp.float32)
    fpr_full = jnp.concatenate([zero, fpr[0, :n]])
    tpr_full = jnp.concatenate([zero, tpr[0, :n]])
    return auc[0, 0], fpr_full, tpr_full


if __name__ == "__main__":
    key = jax.random.PRNGKey(0)
    k_c, k_t = jax.random.split(key)

    # 1-D confids / target of length N (exercises padding: n_pad=1024, grid=(2,2)).
    N = 1000
    confids = jax.random.uniform(k_c, (N,), dtype=jnp.float32)
    target = jax.random.bernoulli(k_t, p=0.5, shape=(N,)).astype(jnp.int32)

    auc, fpr, tpr = auroc_forward(confids, target)
    jax.block_until_ready((auc, fpr, tpr))

    # Reference check: AUROC == Mann-Whitney U statistic (ties weighted 0.5).
    c_np = np.asarray(confids, dtype=np.float64)
    t_np = np.asarray(target)
    pos, neg = c_np[t_np == 1], c_np[t_np == 0]
    gt = (pos[:, None] > neg[None, :]).sum()
    eq = (pos[:, None] == neg[None, :]).sum()
    auc_ref = (gt + 0.5 * eq) / (len(pos) * len(neg))

    assert fpr.shape == (N + 1,) and tpr.shape == (N + 1,)
    assert abs(float(auc) - auc_ref) < 1e-5, (float(auc), auc_ref)
    assert abs(float(fpr[-1]) - 1.0) < 1e-6 and abs(float(tpr[-1]) - 1.0) < 1e-6
    assert bool(jnp.all(jnp.diff(fpr) >= -1e-6)) and bool(jnp.all(jnp.diff(tpr) >= -1e-6))

    print("KERNEL_OK")
</pallas_src>

<mosaic_0001>
module attributes {stable_mosaic.version = 11 : i64} {
  func.func @_auroc_kernel(%arg0: i32, %arg1: i32, %arg2: memref<512x1xf32, #tpu.memory_space<vmem>>, %arg3: memref<1x512xf32, #tpu.memory_space<vmem>>, %arg4: memref<2x512xbf16, #tpu.memory_space<vmem>>, %arg5: memref<1xf32, #tpu.memory_space<smem>>, %arg6: memref<1xf32, #tpu.memory_space<smem>>, %arg7: memref<1x1xf32, #tpu.memory_space<vmem>>, %arg8: memref<1x512xf32, #tpu.memory_space<vmem>>, %arg9: memref<1x512xf32, #tpu.memory_space<vmem>>, %arg10: memref<2x512xf32, #tpu.memory_space<vmem>>, %arg11: memref<1x1xf32, #tpu.memory_space<vmem>>, %arg12: memref<1x1xf32, #tpu.memory_space<vmem>>) attributes {dimension_semantics = [#tpu.dimension_semantics<arbitrary>, #tpu.dimension_semantics<arbitrary>], iteration_bounds = array<i64: 2, 2>, scalar_prefetch = 0 : i64, scratch_operands = 3 : i64, tpu.core_type = #tpu.core_type<tc>, window_params = [{transform_indices = @transform_0, window_bounds = array<i64: 512, 1>}, {transform_indices = @transform_1, window_bounds = array<i64: 1, 512>}, {transform_indices = @transform_2, window_bounds = array<i64: 2, 512>}, {transform_indices = @transform_3, window_bounds = array<i64: 1>}, {transform_indices = @transform_4, window_bounds = array<i64: 1>}, {pipeline_mode = #tpu.pipeline_mode<synchronous>, transform_indices = @transform_5, window_bounds = array<i64: 1, 1>}, {transform_indices = @transform_6, window_bounds = array<i64: 1, 512>}, {transform_indices = @transform_7, window_bounds = array<i64: 1, 512>}]} {
    %c0_i32 = arith.constant 0 : i32
    %0 = arith.cmpi eq, %arg0, %c0_i32 : i32
    %c0_i32_0 = arith.constant 0 : i32
    %1 = arith.cmpi eq, %arg1, %c0_i32_0 : i32
    %2 = arith.andi %0, %1 : i1
    %3 = arith.extui %2 : i1 to i32
    %c0_i32_1 = arith.constant 0 : i32
    %4 = arith.cmpi ne, %3, %c0_i32_1 : i32
    scf.if %4 {
      %cst_14 = arith.constant 0.000000e+00 : f32
      %24 = vector.broadcast %cst_14 : f32 to vector<1x1xf32>
      %c0_15 = arith.constant 0 : index
      %c0_16 = arith.constant 0 : index
      %25 = vector.load %arg7[%c0_15, %c0_16] : memref<1x1xf32, #tpu.memory_space<vmem>>, vector<1x1xf32>
      tpu.vector_store %arg7[%c0_15, %c0_16], %24 {strides = array<i32>} : memref<1x1xf32, #tpu.memory_space<vmem>>, vector<1x1xf32>,
      %cst_17 = arith.constant 0.000000e+00 : f32
      %26 = vector.broadcast %cst_17 : f32 to vector<1x1xf32>
      %c0_18 = arith.constant 0 : index
      %c0_19 = arith.constant 0 : index
      %27 = vector.load %arg11[%c0_18, %c0_19] : memref<1x1xf32, #tpu.memory_space<vmem>>, vector<1x1xf32>
      tpu.vector_store %arg11[%c0_18, %c0_19], %26 {strides = array<i32>} : memref<1x1xf32, #tpu.memory_space<vmem>>, vector<1x1xf32>,
      %cst_20 = arith.constant 0.000000e+00 : f32
      %28 = vector.broadcast %cst_20 : f32 to vector<1x1xf32>
      %c0_21 = arith.constant 0 : index
      %c0_22 = arith.constant 0 : index
      %29 = vector.load %arg12[%c0_21, %c0_22] : memref<1x1xf32, #tpu.memory_space<vmem>>, vector<1x1xf32>
      tpu.vector_store %arg12[%c0_21, %c0_22], %28 {strides = array<i32>} : memref<1x1xf32, #tpu.memory_space<vmem>>, vector<1x1xf32>,
    } else {
    }
    %c0_i32_2 = arith.constant 0 : i32
    %5 = arith.cmpi eq, %arg1, %c0_i32_2 : i32
    %6 = arith.extui %5 : i1 to i32
    %c0_i32_3 = arith.constant 0 : i32
    %7 = arith.cmpi ne, %6, %c0_i32_3 : i32
    scf.if %7 {
      %cst_14 = arith.constant 0.000000e+00 : f32
      %24 = vector.broadcast %cst_14 : f32 to vector<2x512xf32>
      %c0_15 = arith.constant 0 : index
      %c0_16 = arith.constant 0 : index
      %25 = vector.load %arg10[%c0_15, %c0_16] : memref<2x512xf32, #tpu.memory_space<vmem>>, vector<2x512xf32>
      tpu.vector_store %arg10[%c0_15, %c0_16], %24 {strides = array<i32>} : memref<2x512xf32, #tpu.memory_space<vmem>>, vector<2x512xf32>,
    } else {
    }
    %c0 = arith.constant 0 : index
    %c0_4 = arith.constant 0 : index
    %8 = vector.load %arg2[%c0, %c0_4] : memref<512x1xf32, #tpu.memory_space<vmem>>, vector<512x1xf32>
    %c0_5 = arith.constant 0 : index
    %c0_6 = arith.constant 0 : index
    %9 = vector.load %arg3[%c0_5, %c0_6] : memref<1x512xf32, #tpu.memory_space<vmem>>, vector<1x512xf32>
    %10 = vector.broadcast %8 : vector<512x1xf32> to vector<512x512xf32>
    %11 = vector.broadcast %9 : vector<1x512xf32> to vector<512x512xf32>
    %12 = arith.cmpf oge, %10, %11 : vector<512x512xf32>
    %13 = arith.extui %12 : vector<512x512xi1> to vector<512x512xi32>
    %14 = arith.sitofp %13 : vector<512x512xi32> to vector<512x512xf32>
    %15 = arith.truncf %14 : vector<512x512xf32> to vector<512x512xbf16>
    %c0_7 = arith.constant 0 : index
    %c0_8 = arith.constant 0 : index
    %16 = vector.load %arg10[%c0_7, %c0_8] : memref<2x512xf32, #tpu.memory_space<vmem>>, vector<2x512xf32>
    %c0_9 = arith.constant 0 : index
    %c0_10 = arith.constant 0 : index
    %17 = vector.load %arg4[%c0_9, %c0_10] : memref<2x512xbf16, #tpu.memory_space<vmem>>, vector<2x512xbf16>
    %cst = arith.constant dense<0.000000e+00> : vector<2x512xf32>
    %18 = tpu.matmul %17, %15, %cst {dimension_numbers = #tpu.dot_dimension_numbers<[1], [0], [0], [1], [0, 0, 1, 1], [], []>} : vector<2x512xbf16>, vector<512x512xbf16>, vector<2x512xf32> -> vector<2x512xf32>
    %19 = arith.addf %16, %18 : vector<2x512xf32>
    %c0_11 = arith.constant 0 : index
    %c0_12 = arith.constant 0 : index
    %20 = vector.load %arg10[%c0_11, %c0_12] : memref<2x512xf32, #tpu.memory_space<vmem>>, vector<2x512xf32>
    tpu.vector_store %arg10[%c0_11, %c0_12], %19 {strides = array<i32>} : memref<2x512xf32, #tpu.memory_space<vmem>>, vector<2x512xf32>,
    %c1_i32 = arith.constant 1 : i32
    %21 = arith.cmpi eq, %arg1, %c1_i32 : i32
    %22 = arith.extui %21 : i1 to i32
    %c0_i32_13 = arith.constant 0 : i32
    %23 = arith.cmpi ne, %22, %c0_i32_13 : i32
    scf.if %23 {
      %c0_14 = arith.constant 0 : index
      %c0_15 = arith.constant 0 : index
      %24 = vector.load %arg10[%c0_14, %c0_15] : memref<2x512xf32, #tpu.memory_space<vmem>>, vector<2x512xf32>
      %25 = vector.extract_strided_slice %24 {offsets = [0, 0], sizes = [1, 512], strides = [1, 1]} : vector<2x512xf32> to vector<1x512xf32>
      %26 = vector.extract_strided_slice %24 {offsets = [1, 0], sizes = [1, 512], strides = [1, 1]} : vector<2x512xf32> to vector<1x512xf32>
      %27 = arith.subf %26, %25 : vector<1x512xf32>
      %c0_16 = arith.constant 0 : index
      %28 = memref.load %arg5[%c0_16] : memref<1xf32, #tpu.memory_space<smem>>
      %29 = vector.broadcast %28 : f32 to vector<1x512xf32>
      %30 = arith.mulf %25, %29 : vector<1x512xf32>
      %c0_17 = arith.constant 0 : index
      %31 = memref.load %arg6[%c0_17] : memref<1xf32, #tpu.memory_space<smem>>
      %32 = vector.broadcast %31 : f32 to vector<1x512xf32>
      %33 = arith.mulf %27, %32 : vector<1x512xf32>
      %34 = tpu.iota {dimensions = array<i32: 1>} : vector<1x512xi32>
      %c0_i32_18 = arith.constant 0 : i32
      %35 = vector.broadcast %c0_i32_18 : i32 to vector<1x512xi32>
      %36 = arith.cmpi eq, %34, %35 : vector<1x512xi32>
      %c0_19 = arith.constant 0 : index
      %c0_20 = arith.constant 0 : index
      %37 = vector.load %arg11[%c0_19, %c0_20] : memref<1x1xf32, #tpu.memory_space<vmem>>, vector<1x1xf32>
      %c1_i32_21 = arith.constant 1 : i32
      %38 = tpu.dynamic_rotate %33 by %c1_i32_21 dim 1 : vector<1x512xf32>, i32 -> vector<1x512xf32>
      %39 = vector.shape_cast %37 : vector<1x1xf32> to vector<1x1xf32>
      %40 = vector.broadcast %39 : vector<1x1xf32> to vector<1x512xf32>
      %41 = arith.select %36, %40, %38 : vector<1x512xi1>, vector<1x512xf32>
      %c0_i32_22 = arith.constant 0 : i32
      %42 = vector.broadcast %c0_i32_22 : i32 to vector<1x512xi32>
      %43 = arith.cmpi eq, %34, %42 : vector<1x512xi32>
      %c0_23 = arith.constant 0 : index
      %c0_24 = arith.constant 0 : index
      %44 = vector.load %arg12[%c0_23, %c0_24] : memref<1x1xf32, #tpu.memory_space<vmem>>, vector<1x1xf32>
      %c1_i32_25 = arith.constant 1 : i32
      %45 = tpu.dynamic_rotate %30 by %c1_i32_25 dim 1 : vector<1x512xf32>, i32 -> vector<1x512xf32>
      %46 = vector.shape_cast %44 : vector<1x1xf32> to vector<1x1xf32>
      %47 = vector.broadcast %46 : vector<1x1xf32> to vector<1x512xf32>
      %48 = arith.select %43, %47, %45 : vector<1x512xi1>, vector<1x512xf32>
      %49 = arith.subf %33, %41 : vector<1x512xf32>
      %50 = arith.addf %30, %48 : vector<1x512xf32>
      %51 = arith.mulf %49, %50 : vector<1x512xf32>
      %cst_26 = arith.constant dense<0.000000e+00> : vector<1xf32>
      %52 = vector.multi_reduction <add>, %51, %cst_26 [1] : vector<1x512xf32> to vector<1xf32>
      %53 = vector.shape_cast %52 : vector<1xf32> to vector<1x1xf32>
      %cst_27 = arith.constant 5.000000e-01 : f32
      %54 = vector.broadcast %cst_27 : f32 to vector<1x1xf32>
      %55 = arith.mulf %54, %53 : vector<1x1xf32>
      %c0_28 = arith.constant 0 : index
      %c0_29 = arith.constant 0 : index
      %56 = vector.load %arg7[%c0_28, %c0_29] : memref<1x1xf32, #tpu.memory_space<vmem>>, vector<1x1xf32>
      %57 = arith.addf %56, %55 : vector<1x1xf32>
      %c0_30 = arith.constant 0 : index
      %c0_31 = arith.constant 0 : index
      %58 = vector.load %arg7[%c0_30, %c0_31] : memref<1x1xf32, #tpu.memory_space<vmem>>, vector<1x1xf32>
      tpu.vector_store %arg7[%c0_30, %c0_31], %57 {strides = array<i32>} : memref<1x1xf32, #tpu.memory_space<vmem>>, vector<1x1xf32>,
      %cst_32 = arith.constant dense<0xFF800000> : vector<1xf32>
      %59 = vector.multi_reduction <maximumf>, %33, %cst_32 [1] : vector<1x512xf32> to vector<1xf32>
      %60 = vector.shape_cast %59 : vector<1xf32> to vector<1x1xf32>
      %c0_33 = arith.constant 0 : index
      %c0_34 = arith.constant 0 : index
      %61 = vector.load %arg11[%c0_33, %c0_34] : memref<1x1xf32, #tpu.memory_space<vmem>>, vector<1x1xf32>
      tpu.vector_store %arg11[%c0_33, %c0_34], %60 {strides = array<i32>} : memref<1x1xf32, #tpu.memory_space<vmem>>, vector<1x1xf32>,
      %cst_35 = arith.constant dense<0xFF800000> : vector<1xf32>
      %62 = vector.multi_reduction <maximumf>, %30, %cst_35 [1] : vector<1x512xf32> to vector<1xf32>
      %63 = vector.shape_cast %62 : vector<1xf32> to vector<1x1xf32>
      %c0_36 = arith.constant 0 : index
      %c0_37 = arith.constant 0 : index
      %64 = vector.load %arg12[%c0_36, %c0_37] : memref<1x1xf32, #tpu.memory_space<vmem>>, vector<1x1xf32>
      tpu.vector_store %arg12[%c0_36, %c0_37], %63 {strides = array<i32>} : memref<1x1xf32, #tpu.memory_space<vmem>>, vector<1x1xf32>,
      %c0_38 = arith.constant 0 : index
      %c0_39 = arith.constant 0 : index
      %65 = vector.load %arg8[%c0_38, %c0_39] : memref<1x512xf32, #tpu.memory_space<vmem>>, vector<1x512xf32>
      tpu.vector_store %arg8[%c0_38, %c0_39], %33 {strides = array<i32>} : memref<1x512xf32, #tpu.memory_space<vmem>>, vector<1x512xf32>,
      %c0_40 = arith.constant 0 : index
      %c0_41 = arith.constant 0 : index
      %66 = vector.load %arg9[%c0_40, %c0_41] : memref<1x512xf32, #tpu.memory_space<vmem>>, vector<1x512xf32>
      tpu.vector_store %arg9[%c0_40, %c0_41], %30 {strides = array<i32>} : memref<1x512xf32, #tpu.memory_space<vmem>>, vector<1x512xf32>,
    } else {
    }
    return
  }
  func.func @transform_0(%arg0: i32, %arg1: i32) -> (i32, i32) {
    %c0_i32 = arith.constant 0 : i32
    %c0_i32_0 = arith.constant 0 : i32
    return %arg1, %c0_i32 : i32, i32
  }
  func.func @transform_1(%arg0: i32, %arg1: i32) -> (i32, i32) {
    %c0_i32 = arith.constant 0 : i32
    %c0_i32_0 = arith.constant 0 : i32
    return %c0_i32, %arg0 : i32, i32
  }
  func.func @transform_2(%arg0: i32, %arg1: i32) -> (i32, i32) {
    %c0_i32 = arith.constant 0 : i32
    %c0_i32_0 = arith.constant 0 : i32
    return %c0_i32, %arg1 : i32, i32
  }
  func.func @transform_3(%arg0: i32, %arg1: i32) -> i32 {
    %c0_i32 = arith.constant 0 : i32
    %c0_i32_0 = arith.constant 0 : i32
    return %c0_i32 : i32
  }
  func.func @transform_4(%arg0: i32, %arg1: i32) -> i32 {
    %c0_i32 = arith.constant 0 : i32
    %c0_i32_0 = arith.constant 0 : i32
    return %c0_i32 : i32
  }
  func.func @transform_5(%arg0: i32, %arg1: i32) -> (i32, i32) {
    %c0_i32 = arith.constant 0 : i32
    %c0_i32_0 = arith.constant 0 : i32
    %c0_i32_1 = arith.constant 0 : i32
    return %c0_i32, %c0_i32_0 : i32, i32
  }
  func.func @transform_6(%arg0: i32, %arg1: i32) -> (i32, i32) {
    %c0_i32 = arith.constant 0 : i32
    %c0_i32_0 = arith.constant 0 : i32
    return %c0_i32, %arg0 : i32, i32
  }
  func.func @transform_7(%arg0: i32, %arg1: i32) -> (i32, i32) {
    %c0_i32 = arith.constant 0 : i32
    %c0_i32_0 = arith.constant 0 : i32
    return %c0_i32, %arg0 : i32, i32
  }
}

</mosaic_0001>

<bundles_post_ra>
// kernel: neg.1
= control target key start
LH: loop header
LB: loop body
LE: loop exit
PB: predicated region body
PF: predicated region fallthrough
CT: control target
= control target key end

     0   :  { %s24_s0 = inlined_call_operand.vmem [shape: f32[1000], index: 0, kind: input, shape index: {}]   ;;  %s25_s1 = inlined_call_operand.vmem [shape: f32[1000], index: 1, kind: output, shape index: {}]  }
   0x1   :  { %v2_v0 = vld [vmem:[%s24_s0] sm:$0xff] }
   0x2   :  { %v5_v1 = vxor.u32 2147483648, %v2_v0 }
   0x4   :  { %7 = vst [vmem:[%s25_s1] sm:$0xff] %v5_v1 }

// kernel: auroc_forward.1
= control target key start
LH: loop header
LB: loop body
LE: loop exit
PB: predicated region body
PF: predicated region fallthrough
CT: control target
= control target key end

     0   :  { %s3773_s0 = inlined_call_operand.vmem [shape: f32[1024,1], index: 0, kind: input, shape index: {}]   ;;  %s3774_s1 = inlined_call_operand.vmem [shape: f32[1,1024], index: 1, kind: input, shape index: {}]   ;;  %s3775_s2 = inlined_call_operand.vmem [shape: bf16[2,1024], index: 2, kind: input, shape index: {}]   ;;  %s3776_s3 = inlined_call_operand.<no memory space> [shape: f32[1], index: 3, kind: input, shape index: {}]   ;;  %s3777_s4 = inlined_call_operand.<no memory space> [shape: f32[1], index: 4, kind: input, shape index: {}]   ;;  %s3778_s5 = inlined_call_operand.hbm [shape: f32[1,1], index: 5, kind: output, shape index: {0}]   ;;  %s3779_s6 = inlined_call_operand.vmem [shape: f32[1,1024], index: 6, kind: output, shape index: {1}]   ;;  %s3780_s7 = inlined_call_operand.vmem [shape: f32[1,1024], index: 7, kind: output, shape index: {2}]  }
   0x1   :  { %13 = sst [smem:[#allocation5]] %s3776_s3 }
   0x2   :  { %14 = sst [smem:[#allocation6]] %s3777_s4 }
   0x3   :  { %15 = vsyncpa [#allocation8], 0  ;;  %s2987_s28 = smov 0   ;;  %s2989_s29 = smov 0  }
   0x4   :  { %s2991_s30 = smov 0   ;;  %s2993_s8 = smov 0  }
   0x5   :  { %s2995_s9 = smov 0  }
   0x6 LB: > { %s2266_s3 = sadd.s32 4294967295, %s2930_s9   ;;  %s30_s4 = sadd.s32 1, %s2922_s30  ;;  %s2930_s9 = sphi %s2995_s9, %s21_s9   ;;  %s2926_s8 = sphi %s2993_s8, %s3785_s8   ;;  %s2922_s30 = sphi %s2991_s30, %s3784_s30   ;;  %s2918_s29 = sphi %s2989_s29, %s3783_s29   ;;  %s2914_s28 = sphi %s2987_s28, %s3782_s28  }
   0x7   : > { %p31_p0 = scmp.ge.s32.totalorder %s30_s4, 2  ;;  %s33_s10 = sadd.s32 1, %s2926_s8 }
   0x8   : > { %p2270_p1 = scmp.ge.s32.totalorder %s2930_s9, 1  ;;  %p273_p2 = scmp.lt.s32.totalorder %s2930_s9, 5 }
   0x9   : > { %s3787_s4 = smov (%p31_p0, %s30_s4), 0  ;;  %s3789_s10 = smov (!%p31_p0, %s33_s10), %s2926_s8 }
   0xa   : > { %p274_p3 = pnand %p2270_p1, %p273_p2  ;;  %p35_p4 = scmp.ge.s32.totalorder %s3789_s10, 2 }
   0xb   : > { %s2271_s11 = sshll.u32 (!%p274_p3), %s2914_s28, 6  ;;  %s2273_s12 = sshll.u32 (!%p274_p3), %s2918_s29, 2 }
   0xc   : > { %s3791_s10 = smov (%p35_p4, %s3789_s10), 0  ;;  %277 = sbr.rel (%p274_p3) target bundleno = 869 (0x365), region = 40 }
   0xd   : > { %p317_p5 = scmp.lt.s32.totalorder (!%p274_p3), %s2271_s11, 127  ;;  %p323_p6 = scmp.lt.s32.totalorder (!%p274_p3), %s2273_s12, 7 }
   0xe   : > { %s2274_s13 = sshll.u32 (!%p274_p3), %s2914_s28, 2  ;;  %p342_p7 = scmp.eq.s32.totalorder (!%p274_p3), %s2918_s29, 0 }
   0xf   : > { %p328_p8 = scmp.lt.s32.totalorder (!%p274_p3), %s2274_s13, 7  ;;  %p343_p9 = scmp.eq.s32.totalorder (!%p274_p3), %s2914_s28, 0 }
  0x11   : > { %p344_p10 = pnand (!%p274_p3), %p343_p9, %p342_p7 }
  0x13   : > { %s3793_s11 = smov (!%p317_p5, %s2271_s11), 127  ;;  %s3795_s12 = smov (!%p323_p6, %s2273_s12), 7 }
  0x14   : > { %s2272_s14 = sshll.u32 %s3793_s11, 3  ;;  %s325_s20 = scalar_lea.vmem %s3774_s1, %s3795_s12  ;;  %vm348_vm0 = vcmask (!%p344_p10), 0   ;;  %v2932_v0 = vmov (!%p344_p10), 0.0  }
  0x15   : > { %s3031_s17 = scalar_lea.vmem %s3773_s0, %s2272_s14  ;;  %s3797_s13 = smov (!%p328_p8, %s2274_s13), 7  ;;  %349 = vst.msk [vmem:[#allocation7] sm:$0x1] (!%p344_p10), %vm348_vm0, %v2932_v0  ;;  %350 = vst.msk [vmem:[#allocation3] sm:$0x1] (!%p344_p10), %vm348_vm0, %v2932_v0 }
  0x16   : > { %s335_s23 = scalar_lea.vmem %s3779_s6, %s3795_s12  ;;  %s340_s26 = scalar_lea.vmem %s3780_s7, %s3795_s12  ;;  %351 = vst.msk [vmem:[#allocation4] sm:$0x1] (!%p344_p10), %vm348_vm0, %v2932_v0 }
  0x17   : > { %s330_s11 = scalar_lea.vmem %s3775_s2, %s3797_s13  ;;  %347 = sbr.rel (%p344_p10) target bundleno = 30 (0x1e), region = 44 }
  0x1e PF: > { %p2277_p11 = scmp.ne.s32.totalorder %s2914_s28, 0 }
  0x1f   : > { %v2933_v1 = vmov (!%p2277_p11), 0.0  }
  0x20   : > { %354 = sbr.rel (%p2277_p11) target bundleno = 39 (0x27), region = 48  ;;  %355 = vst [vmem:[#allocation2] sm:$0xff] (!%p2277_p11), %v2933_v1 }
  0x27 PF: > { %v358_v2 = vld [vmem:[%s3031_s17 + $0x10] sm:$0xff]  ;;  %v356_v3 = vld [vmem:[%s3031_s17] sm:$0xff]  ;;  %v2934_v4 = vmov 0   ;;  %v359_v5 = vld [vmem:[%s3031_s17 + $0x18] sm:$0xff]  ;;  %v742_v39 = vlaneseq  ;;  %v2935_v42 = vmov 1966171168  }
  0x28   : > { %2860 = vset.pattern.permute.xlu1 %v2934_v4  ;;  %2859 = vset.pattern.permute.xlu0 %v2934_v4  ;;  %v357_v6 = vld [vmem:[%s3031_s17 + $0x8] sm:$0xff]  ;;  %v360_v8 = vld [vmem:[%s3031_s17 + $0x20] sm:$0xff]  ;;  %v363_v9 = vld [vmem:[%s3031_s17 + $0x38] sm:$0xff]  ;;  %v1670_v43 = vunpack.c.l.s4 %v2935_v42  ;;  %p2791_p12 = scmp.ne.s32.totalorder %s2914_s28, 1 }
  0x29   : > { %433 = vperm.xlu1 %2860, %v358_v2   ;;  %423 = vperm.xlu0 %2859, %v356_v3   ;;  %v361_v7 = vld [vmem:[%s3031_s17 + $0x28] sm:$0xff]  ;;  %v362_v10 = vld [vmem:[%s3031_s17 + $0x30] sm:$0xff]  ;;  %v364_v12 = vld [vmem:[%s3031_s17 + $0x40] sm:$0xff]  ;;  %v3092_v44 = vshrl.u32 %v742_v39, 7  ;;  %s1886_s18 = sld [smem:[#allocation5]] (!%p2791_p12)  ;;  %s2939_s28 = smov (!%p2791_p12), 1  }
  0x2a   : > { %v365_v11 = vld [vmem:[%s3031_s17 + $0x48] sm:$0xff]  ;;  %v367_v13 = vld [vmem:[%s3031_s17 + $0x58] sm:$0xff]  ;;  %v366_v14 = vld [vmem:[%s3031_s17 + $0x50] sm:$0xff]  ;;  %v1671_v46 = vunpack.c.0.s8 %v1670_v43 }
  0x2b   : > { %v369_v15 = vld [vmem:[%s3031_s17 + $0x68] sm:$0xff]  ;;  %v368_v16 = vld [vmem:[%s3031_s17 + $0x60] sm:$0xff]  ;;  %v371_v17 = vld [vmem:[%s3031_s17 + $0x78] sm:$0xff] }
  0x2c   : > { %v370_v18 = vld [vmem:[%s3031_s17 + $0x70] sm:$0xff]  ;;  %v373_v19 = vld [vmem:[%s3031_s17 + $0x88] sm:$0xff]  ;;  %v372_v20 = vld [vmem:[%s3031_s17 + $0x80] sm:$0xff]  ;;  %v3102_v50 = vsub.s32 %v1671_v46, %v3092_v44 }
  0x2d   : > { %438 = vperm.xlu1 %2860, %v359_v5   ;;  %428 = vperm.xlu0 %2859, %v357_v6   ;;  %v375_v21 = vld [vmem:[%s3031_s17 + $0x98] sm:$0xff]  ;;  %v374_v22 = vld [vmem:[%s3031_s17 + $0x90] sm:$0xff]  ;;  %v377_v23 = vld [vmem:[%s3031_s17 + $0xa8] sm:$0xff] }
  0x2e   : > { %v376_v24 = vld [vmem:[%s3031_s17 + $0xa0] sm:$0xff]  ;;  %v379_v25 = vld [vmem:[%s3031_s17 + $0xb8] sm:$0xff]  ;;  %v378_v26 = vld [vmem:[%s3031_s17 + $0xb0] sm:$0xff] }
  0x2f   : > { %v381_v27 = vld [vmem:[%s3031_s17 + $0xc8] sm:$0xff]  ;;  %v380_v28 = vld [vmem:[%s3031_s17 + $0xc0] sm:$0xff]  ;;  %v383_v29 = vld [vmem:[%s3031_s17 + $0xd8] sm:$0xff] }
  0x30   : > { %v382_v30 = vld [vmem:[%s3031_s17 + $0xd0] sm:$0xff]  ;;  %v385_v31 = vld [vmem:[%s3031_s17 + $0xe8] sm:$0xff]  ;;  %v384_v32 = vld [vmem:[%s3031_s17 + $0xe0] sm:$0xff] }
  0x31   : > { %448 = vperm.xlu1 %2860, %v361_v7   ;;  %443 = vperm.xlu0 %2859, %v360_v8   ;;  %v387_v33 = vld [vmem:[%s3031_s17 + $0xf8] sm:$0xff]  ;;  %v386_v34 = vld [vmem:[%s3031_s17 + $0xf0] sm:$0xff]  ;;  %v389_v35 = vld [vmem:[%s3031_s17 + $0x108] sm:$0xff] }
  0x32   : > { %v388_v36 = vld [vmem:[%s3031_s17 + $0x100] sm:$0xff]  ;;  %v391_v37 = vld [vmem:[%s3031_s17 + $0x118] sm:$0xff]  ;;  %v390_v38 = vld [vmem:[%s3031_s17 + $0x110] sm:$0xff] }
  0x33   : > { %v393_v40 = vld [vmem:[%s3031_s17 + $0x128] sm:$0xff]  ;;  %v392_v41 = vld [vmem:[%s3031_s17 + $0x120] sm:$0xff]  ;;  %v395_v48 = vld [vmem:[%s3031_s17 + $0x138] sm:$0xff] }
  0x34   : > { %v2534_v45 = vld.sshfl [vmem:[%s330_s11] sm:$0x33 pattern:$0x75316420]  ;;  %v394_v49 = vld [vmem:[%s3031_s17 + $0x130] sm:$0xff]  ;;  %v397_v53 = vld [vmem:[%s3031_s17 + $0x148] sm:$0xff] }
  0x35   : > { %458 = vperm.xlu1 %2860, %v363_v9   ;;  %453 = vperm.xlu0 %2859, %v362_v10   ;;  %v1668_v47 = vcombine.high %v2534_v45, %v2534_v45  ;;  %v3108_v52 = vrot.slane %v2534_v45, %v3102_v50  ;;  %v396_v54 = vld [vmem:[%s3031_s17 + $0x140] sm:$0xff]  ;;  %v399_v55 = vld [vmem:[%s3031_s17 + $0x158] sm:$0xff]  ;;  %v398_v56 = vld [vmem:[%s3031_s17 + $0x150] sm:$0xff] }
  0x36   : > { %v401_v57 = vld [vmem:[%s3031_s17 + $0x168] sm:$0xff]  ;;  %v400_v58 = vld [vmem:[%s3031_s17 + $0x160] sm:$0xff]  ;;  %v403_v59 = vld [vmem:[%s3031_s17 + $0x178] sm:$0xff] }
  0x37   : > { %v3105_v51 = vrot.slane %v1668_v47, %v3102_v50  ;;  %v402_v60 = vld [vmem:[%s3031_s17 + $0x170] sm:$0xff]  ;;  %v405_v61 = vld [vmem:[%s3031_s17 + $0x188] sm:$0xff]  ;;  %v404_v62 = vld [vmem:[%s3031_s17 + $0x180] sm:$0xff] }
  0x38   : > { %v407_v63 = vld [vmem:[%s3031_s17 + $0x198] sm:$0xff]  ;;  %v406_v0 = vld [vmem:[%s3031_s17 + $0x190] sm:$0xff]  ;;  %v409_v1 = vld [vmem:[%s3031_s17 + $0x1a8] sm:$0xff] }
  0x39   : > { %468 = vperm.xlu1 %2860, %v365_v11   ;;  %463 = vperm.xlu0 %2859, %v364_v12   ;;  %v408_v2 = vld [vmem:[%s3031_s17 + $0x1a0] sm:$0xff]  ;;  %v411_v3 = vld [vmem:[%s3031_s17 + $0x1b8] sm:$0xff]  ;;  %v410_v4 = vld [vmem:[%s3031_s17 + $0x1b0] sm:$0xff] }
  0x3a   : > { %1721 = vmatprep.mubr.bf16.mxu0 %v3105_v51  ;;  %1803 = vmatprep.mubr.bf16.mxu1 %v3105_v51  ;;  %v413_v5 = vld [vmem:[%s3031_s17 + $0x1c8] sm:$0xff]  ;;  %v412_v6 = vld [vmem:[%s3031_s17 + $0x1c0] sm:$0xff]  ;;  %v415_v7 = vld [vmem:[%s3031_s17 + $0x1d8] sm:$0xff] }
  0x3b   : > { %v414_v8 = vld [vmem:[%s3031_s17 + $0x1d0] sm:$0xff]  ;;  %v417_v9 = vld [vmem:[%s3031_s17 + $0x1e8] sm:$0xff]  ;;  %v416_v10 = vld [vmem:[%s3031_s17 + $0x1e0] sm:$0xff] }
  0x3c   : > { %v419_v11 = vld [vmem:[%s3031_s17 + $0x1f8] sm:$0xff]  ;;  %v418_v12 = vld [vmem:[%s3031_s17 + $0x1f0] sm:$0xff]  ;;  %s1889_s17 = sld [smem:[#allocation6]] (!%p2791_p12) }
  0x3d   : > { %478 = vperm.xlu1 %2860, %v367_v13   ;;  %473 = vperm.xlu0 %2859, %v366_v14   ;;  %v3137_v13 = vsub.s32 1, %v3092_v44  ;;  %v420_v14 = vld [vmem:[%s325_s20] sm:$0xf] }
  0x41   : > { %488 = vperm.xlu1 %2860, %v369_v15   ;;  %483 = vperm.xlu0 %2859, %v368_v16   ;;  %v3145_v15 = vsub.s32 3, %v3092_v44  ;;  %v3148_v16 = vsub.s32 0, %v3092_v44 }
  0x45   : > { %498 = vperm.xlu1 %2860, %v371_v17   ;;  %493 = vperm.xlu0 %2859, %v370_v18  }
  0x49   : > { %508 = vperm.xlu1 %2860, %v373_v19   ;;  %503 = vperm.xlu0 %2859, %v372_v20   ;;  %v752_v19 = vsub.s32 2, %v3092_v44  ;;  %v3152_v20 = vrot.slane %v420_v14, %v3137_v13 }
  0x4d   : > { %518 = vperm.xlu1 %2860, %v375_v21   ;;  %513 = vperm.xlu0 %2859, %v374_v22   ;;  %v3155_v21 = vrot.slane %v420_v14, %v3145_v15  ;;  %v3158_v22 = vrot.slane %v420_v14, %v3148_v16 }
  0x51   : > { %528 = vperm.xlu1 %2860, %v377_v23   ;;  %523 = vperm.xlu0 %2859, %v376_v24  }
  0x55   : > { %538 = vperm.xlu1 %2860, %v379_v25   ;;  %533 = vperm.xlu0 %2859, %v378_v26   ;;  %v3162_v25 = vrot.slane %v420_v14, %v752_v19  ;;  %v2936_v26 = vmov 1.0|1.0  }
  0x59   : > { %548 = vperm.xlu1 %2860, %v381_v27   ;;  %543 = vperm.xlu0 %2859, %v380_v28  }
  0x5d   : > { %558 = vperm.xlu1 %2860, %v383_v29   ;;  %553 = vperm.xlu0 %2859, %v382_v30  }
  0x61   : > { %568 = vperm.xlu1 %2860, %v385_v31   ;;  %563 = vperm.xlu0 %2859, %v384_v32  }
  0x65   : > { %578 = vperm.xlu1 %2860, %v387_v33   ;;  %573 = vperm.xlu0 %2859, %v386_v34  }
  0x69   : > { %588 = vperm.xlu1 %2860, %v389_v35   ;;  %583 = vperm.xlu0 %2859, %v388_v36  }
  0x6d   : > { %598 = vperm.xlu1 %2860, %v391_v37   ;;  %593 = vperm.xlu0 %2859, %v390_v38  }
  0x71   : > { %608 = vperm.xlu1 %2860, %v393_v40   ;;  %603 = vperm.xlu0 %2859, %v392_v41  }
  0x75   : > { %618 = vperm.xlu1 %2860, %v395_v48   ;;  %613 = vperm.xlu0 %2859, %v394_v49  }
  0x79   : > { %628 = vperm.xlu1 %2860, %v397_v53   ;;  %623 = vperm.xlu0 %2859, %v396_v54  }
  0x7d   : > { %638 = vperm.xlu1 %2860, %v399_v55   ;;  %633 = vperm.xlu0 %2859, %v398_v56  }
  0x81   : > { %648 = vperm.xlu1 %2860, %v401_v57   ;;  %643 = vperm.xlu0 %2859, %v400_v58  }
  0x85   : > { %658 = vperm.xlu1 %2860, %v403_v59   ;;  %653 = vperm.xlu0 %2859, %v402_v60  }
  0x89   : > { %668 = vperm.xlu1 %2860, %v405_v61   ;;  %663 = vperm.xlu0 %2859, %v404_v62  }
  0x8d   : > { %678 = vperm.xlu1 %2860, %v407_v63   ;;  %673 = vperm.xlu0 %2859, %v406_v0   ;;  %v1684_v0 = vcombine.high %v3105_v51, %v3105_v51 }
  0x91   : > { %688 = vperm.xlu1 %2860, %v409_v1   ;;  %683 = vperm.xlu0 %2859, %v408_v2  }
  0x95   : > { %698 = vperm.xlu1 %2860, %v411_v3   ;;  %693 = vperm.xlu0 %2859, %v410_v4  }
  0x99   : > { %708 = vperm.xlu1 %2860, %v413_v5   ;;  %703 = vperm.xlu0 %2859, %v412_v6  }
  0x9d   : > { %718 = vperm.xlu1 %2860, %v415_v7   ;;  %713 = vperm.xlu0 %2859, %v414_v8  }
  0xa1   : > { %728 = vperm.xlu1 %2860, %v417_v9   ;;  %723 = vperm.xlu0 %2859, %v416_v10  }
  0xa5   : > { %738 = vperm.xlu1 %2860, %v419_v11   ;;  %733 = vperm.xlu0 %2859, %v418_v12  }
  0xa8   : > { %v434_v17 = vpop.permute.xlu1 %433  ;;  %v424_v18 = vpop.permute.xlu0 %423 }
  0xa9   : > { %vm763_vm1 = vcmp.ge.f32.partialorder %v424_v18, %v3152_v20  ;;  %vm765_vm6 = vcmp.ge.f32.partialorder %v424_v18, %v3155_v21  ;;  %vm762_vm9 = vcmp.ge.f32.partialorder %v424_v18, %v3158_v22  ;;  %vm771_vm10 = vcmp.ge.f32.partialorder %v434_v17, %v3152_v20 }
  0xaa   : > { %vm764_vm13 = vcmp.ge.f32.partialorder %v424_v18, %v3162_v25  ;;  %vm773_vm14 = vcmp.ge.f32.partialorder %v434_v17, %v3155_v21 }
  0xac   : > { %v439_v23 = vpop.permute.xlu1 %438  ;;  %v429_v24 = vpop.permute.xlu0 %428 }
  0xad   : > { %vm767_vm2 = vcmp.ge.f32.partialorder %v429_v24, %v3152_v20  ;;  %vm769_vm3 = vcmp.ge.f32.partialorder %v429_v24, %v3155_v21  ;;  %vm766_vm4 = vcmp.ge.f32.partialorder %v429_v24, %v3158_v22  ;;  %vm768_vm7 = vcmp.ge.f32.partialorder %v429_v24, %v3162_v25 }
  0xae   : > { %vm2535_vm5 = vmpackc.low %vm767_vm2, %vm763_vm1  ;;  %vm775_vm11 = vcmp.ge.f32.partialorder %v439_v23, %v3152_v20  ;;  %vm777_vm15 = vcmp.ge.f32.partialorder %v439_v23, %v3155_v21  ;;  %vm770_vm1 = vcmp.ge.f32.partialorder %v434_v17, %v3158_v22  ;;  %vm774_vm2 = vcmp.ge.f32.partialorder %v439_v23, %v3158_v22 }
  0xaf   : > { %2536 = vmatprep.subr.msk.bf16.mxu0 %vm2535_vm5, %v2936_v26  ;;  %vm2663_vm8 = vmpackc.low %vm769_vm3, %vm765_vm6  ;;  %vm776_vm5 = vcmp.ge.f32.partialorder %v439_v23, %v3162_v25 }
  0xb0   : > { %2664 = vmatprep.subr.msk.bf16.mxu1 %vm2663_vm8, %v2936_v26  ;;  %v449_v27 = vpop.permute.xlu1 %448  ;;  %vm2537_vm12 = vmpackc.low %vm766_vm4, %vm762_vm9  ;;  %v444_v28 = vpop.permute.xlu0 %443  ;;  %vm772_vm4 = vcmp.ge.f32.partialorder %v434_v17, %v3162_v25 }
  0xb1   : > { %2538 = vmatpush1.bf16.msk.msra.mxu0 %vm2537_vm12, %v2936_v26  ;;  %vm2665_vm0 = vmpackc.low %vm768_vm7, %vm764_vm13  ;;  %vm779_vm8 = vcmp.ge.f32.partialorder %v444_v28, %v3152_v20  ;;  %vm783_vm9 = vcmp.ge.f32.partialorder %v449_v27, %v3152_v20  ;;  %vm781_vm12 = vcmp.ge.f32.partialorder %v444_v28, %v3155_v21  ;;  %vm778_vm13 = vcmp.ge.f32.partialorder %v444_v28, %v3158_v22 }
  0xb2   : > { %2666 = vmatpush1.bf16.msk.msra.mxu1 %vm2665_vm0, %v2936_v26  ;;  %vm2539_vm3 = vmpackc.low %vm775_vm11, %vm771_vm10  ;;  %vm785_vm10 = vcmp.ge.f32.partialorder %v449_v27, %v3155_v21  ;;  %vm780_vm0 = vcmp.ge.f32.partialorder %v444_v28, %v3162_v25 }
  0xb3   : > { %2540 = vmatprep.subr.msk.bf16.mxu0 %vm2539_vm3, %v2936_v26  ;;  %vm2667_vm6 = vmpackc.low %vm777_vm15, %vm773_vm14  ;;  %vm782_vm14 = vcmp.ge.f32.partialorder %v449_v27, %v3158_v22  ;;  %vm784_vm3 = vcmp.ge.f32.partialorder %v449_v27, %v3162_v25 }
  0xb4   : > { %2668 = vmatprep.subr.msk.bf16.mxu1 %vm2667_vm6, %v2936_v26  ;;  %v459_v29 = vpop.permute.xlu1 %458  ;;  %vm2541_vm7 = vmpackc.low %vm774_vm2, %vm770_vm1  ;;  %v454_v30 = vpop.permute.xlu0 %453 }
  0xb5   : > { %2542 = vmatpush1.bf16.msk.msra.mxu0 %vm2541_vm7, %v2936_v26  ;;  %vm2669_vm11 = vmpackc.low %vm776_vm5, %vm772_vm4  ;;  %vm787_vm2 = vcmp.ge.f32.partialorder %v454_v30, %v3152_v20  ;;  %vm791_vm6 = vcmp.ge.f32.partialorder %v459_v29, %v3152_v20  ;;  %vm789_vm5 = vcmp.ge.f32.partialorder %v454_v30, %v3155_v21  ;;  %vm786_vm7 = vcmp.ge.f32.partialorder %v454_v30, %v3158_v22 }
  0xb6   : > { %2670 = vmatpush1.bf16.msk.msra.mxu1 %vm2669_vm11, %v2936_v26  ;;  %vm2543_vm15 = vmpackc.low %vm783_vm9, %vm779_vm8  ;;  %vm793_vm8 = vcmp.ge.f32.partialorder %v459_v29, %v3155_v21  ;;  %vm788_vm11 = vcmp.ge.f32.partialorder %v454_v30, %v3162_v25 }
  0xb7   : > { %2544 = vmatprep.subr.msk.bf16.mxu0 %vm2543_vm15, %v2936_v26  ;;  %vm2671_vm1 = vmpackc.low %vm785_vm10, %vm781_vm12  ;;  %vm790_vm12 = vcmp.ge.f32.partialorder %v459_v29, %v3158_v22  ;;  %vm792_vm15 = vcmp.ge.f32.partialorder %v459_v29, %v3162_v25 }
  0xb8   : > { %2672 = vmatprep.subr.msk.bf16.mxu1 %vm2671_vm1, %v2936_v26  ;;  %v469_v31 = vpop.permute.xlu1 %468  ;;  %vm2545_vm4 = vmpackc.low %vm782_vm14, %vm778_vm13  ;;  %v464_v32 = vpop.permute.xlu0 %463 }
  0xb9   : > { %2546 = vmatpush1.bf16.msk.msra.mxu0 %vm2545_vm4, %v2936_v26  ;;  %vm2673_vm9 = vmpackc.low %vm784_vm3, %vm780_vm0  ;;  %vm795_vm14 = vcmp.ge.f32.partialorder %v464_v32, %v3152_v20  ;;  %vm799_vm1 = vcmp.ge.f32.partialorder %v469_v31, %v3152_v20  ;;  %vm797_vm3 = vcmp.ge.f32.partialorder %v464_v32, %v3155_v21  ;;  %vm794_vm4 = vcmp.ge.f32.partialorder %v464_v32, %v3158_v22 }
  0xba   : > { %2674 = vmatpush1.bf16.msk.msra.mxu1 %vm2673_vm9, %v2936_v26  ;;  %vm2547_vm10 = vmpackc.low %vm791_vm6, %vm787_vm2  ;;  %vm801_vm2 = vcmp.ge.f32.partialorder %v469_v31, %v3155_v21  ;;  %vm796_vm9 = vcmp.ge.f32.partialorder %v464_v32, %v3162_v25 }
  0xbb   : > { %2548 = vmatprep.subr.msk.bf16.mxu0 %vm2547_vm10, %v2936_v26  ;;  %vm2675_vm13 = vmpackc.low %vm793_vm8, %vm789_vm5  ;;  %vm798_vm5 = vcmp.ge.f32.partialorder %v469_v31, %v3158_v22  ;;  %vm800_vm10 = vcmp.ge.f32.partialorder %v469_v31, %v3162_v25 }
  0xbc   : > { %2676 = vmatprep.subr.msk.bf16.mxu1 %vm2675_vm13, %v2936_v26  ;;  %v479_v33 = vpop.permute.xlu1 %478  ;;  %vm2549_vm0 = vmpackc.low %vm790_vm12, %vm786_vm7  ;;  %v474_v34 = vpop.permute.xlu0 %473 }
  0xbd   : > { %2550 = vmatpush1.bf16.msk.msra.mxu0 %vm2549_vm0, %v2936_v26  ;;  %vm2677_vm6 = vmpackc.low %vm792_vm15, %vm788_vm11  ;;  %vm803_vm12 = vcmp.ge.f32.partialorder %v474_v34, %v3152_v20  ;;  %vm807_vm13 = vcmp.ge.f32.partialorder %v479_v33, %v3152_v20  ;;  %vm805_vm15 = vcmp.ge.f32.partialorder %v474_v34, %v3155_v21  ;;  %vm802_vm0 = vcmp.ge.f32.partialorder %v474_v34, %v3158_v22 }
  0xbe   : > { %2678 = vmatpush1.bf16.msk.msra.mxu1 %vm2677_vm6, %v2936_v26  ;;  %vm2551_vm8 = vmpackc.low %vm799_vm1, %vm795_vm14  ;;  %vm809_vm14 = vcmp.ge.f32.partialorder %v479_v33, %v3155_v21  ;;  %vm804_vm6 = vcmp.ge.f32.partialorder %v474_v34, %v3162_v25 }
  0xbf   : > { %2552 = vmatprep.subr.msk.bf16.mxu0 %vm2551_vm8, %v2936_v26  ;;  %vm2679_vm7 = vmpackc.low %vm801_vm2, %vm797_vm3  ;;  %vm806_vm3 = vcmp.ge.f32.partialorder %v479_v33, %v3158_v22  ;;  %vm808_vm8 = vcmp.ge.f32.partialorder %v479_v33, %v3162_v25 }
  0xc0   : > { %2680 = vmatprep.subr.msk.bf16.mxu1 %vm2679_vm7, %v2936_v26  ;;  %v489_v35 = vpop.permute.xlu1 %488  ;;  %vm2553_vm11 = vmpackc.low %vm798_vm5, %vm794_vm4  ;;  %v484_v36 = vpop.permute.xlu0 %483 }
  0xc1   : > { %2554 = vmatpush1.bf16.msk.msra.mxu0 %vm2553_vm11, %v2936_v26  ;;  %vm2681_vm1 = vmpackc.low %vm800_vm10, %vm796_vm9  ;;  %vm811_vm5 = vcmp.ge.f32.partialorder %v484_v36, %v3152_v20  ;;  %vm815_vm7 = vcmp.ge.f32.partialorder %v489_v35, %v3152_v20  ;;  %vm813_vm10 = vcmp.ge.f32.partialorder %v484_v36, %v3155_v21  ;;  %vm810_vm11 = vcmp.ge.f32.partialorder %v484_v36, %v3158_v22 }
  0xc2   : > { %2682 = vmatpush1.bf16.msk.msra.mxu1 %vm2681_vm1, %v2936_v26  ;;  %vm2555_vm2 = vmpackc.low %vm807_vm13, %vm803_vm12  ;;  %vm817_vm12 = vcmp.ge.f32.partialorder %v489_v35, %v3155_v21  ;;  %vm812_vm1 = vcmp.ge.f32.partialorder %v484_v36, %v3162_v25 }
  0xc3   : > { %2556 = vmatprep.subr.msk.bf16.mxu0 %vm2555_vm2, %v2936_v26  ;;  %vm2683_vm4 = vmpackc.low %vm809_vm14, %vm805_vm15  ;;  %vm814_vm15 = vcmp.ge.f32.partialorder %v489_v35, %v3158_v22  ;;  %vm816_vm2 = vcmp.ge.f32.partialorder %v489_v35, %v3162_v25 }
  0xc4   : > { %2684 = vmatprep.subr.msk.bf16.mxu1 %vm2683_vm4, %v2936_v26  ;;  %v499_v37 = vpop.permute.xlu1 %498  ;;  %vm2557_vm9 = vmpackc.low %vm806_vm3, %vm802_vm0  ;;  %v494_v38 = vpop.permute.xlu0 %493 }
  0xc5   : > { %2558 = vmatpush1.bf16.msk.msra.mxu0 %vm2557_vm9, %v2936_v26  ;;  %vm2685_vm13 = vmpackc.low %vm808_vm8, %vm804_vm6  ;;  %vm819_vm3 = vcmp.ge.f32.partialorder %v494_v38, %v3152_v20  ;;  %vm823_vm4 = vcmp.ge.f32.partialorder %v499_v37, %v3152_v20  ;;  %vm821_vm8 = vcmp.ge.f32.partialorder %v494_v38, %v3155_v21  ;;  %vm818_vm9 = vcmp.ge.f32.partialorder %v494_v38, %v3158_v22 }
  0xc6   : > { %2686 = vmatpush1.bf16.msk.msra.mxu1 %vm2685_vm13, %v2936_v26  ;;  %vm2559_vm14 = vmpackc.low %vm815_vm7, %vm811_vm5  ;;  %vm825_vm5 = vcmp.ge.f32.partialorder %v499_v37, %v3155_v21  ;;  %vm820_vm13 = vcmp.ge.f32.partialorder %v494_v38, %v3162_v25 }
  0xc7   : > { %2560 = vmatprep.subr.msk.bf16.mxu0 %vm2559_vm14, %v2936_v26  ;;  %vm2687_vm0 = vmpackc.low %vm817_vm12, %vm813_vm10  ;;  %vm822_vm10 = vcmp.ge.f32.partialorder %v499_v37, %v3158_v22  ;;  %vm824_vm14 = vcmp.ge.f32.partialorder %v499_v37, %v3162_v25 }
  0xc8   : > { %2688 = vmatprep.subr.msk.bf16.mxu1 %vm2687_vm0, %v2936_v26  ;;  %v509_v40 = vpop.permute.xlu1 %508  ;;  %vm2561_vm6 = vmpackc.low %vm814_vm15, %vm810_vm11  ;;  %v504_v41 = vpop.permute.xlu0 %503 }
  0xc9   : > { %2562 = vmatpush1.bf16.msk.msra.mxu0 %vm2561_vm6, %v2936_v26  ;;  %vm2689_vm7 = vmpackc.low %vm816_vm2, %vm812_vm1  ;;  %vm827_vm15 = vcmp.ge.f32.partialorder %v504_v41, %v3152_v20  ;;  %vm831_vm0 = vcmp.ge.f32.partialorder %v509_v40, %v3152_v20  ;;  %vm829_vm2 = vcmp.ge.f32.partialorder %v504_v41, %v3155_v21  ;;  %vm826_vm6 = vcmp.ge.f32.partialorder %v504_v41, %v3158_v22 }
  0xca   : > { %2690 = vmatpush1.bf16.msk.msra.mxu1 %vm2689_vm7, %v2936_v26  ;;  %vm2563_vm12 = vmpackc.low %vm823_vm4, %vm819_vm3  ;;  %vm833_vm3 = vcmp.ge.f32.partialorder %v509_v40, %v3155_v21  ;;  %vm828_vm7 = vcmp.ge.f32.partialorder %v504_v41, %v3162_v25 }
  0xcb   : > { %2564 = vmatprep.subr.msk.bf16.mxu0 %vm2563_vm12, %v2936_v26  ;;  %vm2691_vm11 = vmpackc.low %vm825_vm5, %vm821_vm8  ;;  %vm830_vm8 = vcmp.ge.f32.partialorder %v509_v40, %v3158_v22  ;;  %vm832_vm12 = vcmp.ge.f32.partialorder %v509_v40, %v3162_v25 }
  0xcc   : > { %2692 = vmatprep.subr.msk.bf16.mxu1 %vm2691_vm11, %v2936_v26  ;;  %v519_v42 = vpop.permute.xlu1 %518  ;;  %vm2565_vm1 = vmpackc.low %vm822_vm10, %vm818_vm9  ;;  %v514_v43 = vpop.permute.xlu0 %513 }
  0xcd   : > { %2566 = vmatpush1.bf16.msk.msra.mxu0 %vm2565_vm1, %v2936_v26  ;;  %vm2693_vm4 = vmpackc.low %vm824_vm14, %vm820_vm13  ;;  %vm835_vm10 = vcmp.ge.f32.partialorder %v514_v43, %v3152_v20  ;;  %vm839_vm11 = vcmp.ge.f32.partialorder %v519_v42, %v3152_v20  ;;  %vm837_vm14 = vcmp.ge.f32.partialorder %v514_v43, %v3155_v21  ;;  %vm834_vm1 = vcmp.ge.f32.partialorder %v514_v43, %v3158_v22 }
  0xce   : > { %2694 = vmatpush1.bf16.msk.msra.mxu1 %vm2693_vm4, %v2936_v26  ;;  %vm2567_vm5 = vmpackc.low %vm831_vm0, %vm827_vm15  ;;  %vm841_vm15 = vcmp.ge.f32.partialorder %v519_v42, %v3155_v21  ;;  %vm836_vm4 = vcmp.ge.f32.partialorder %v514_v43, %v3162_v25 }
  0xcf   : > { %2568 = vmatprep.subr.msk.bf16.mxu0 %vm2567_vm5, %v2936_v26  ;;  %vm2695_vm9 = vmpackc.low %vm833_vm3, %vm829_vm2  ;;  %vm838_vm2 = vcmp.ge.f32.partialorder %v519_v42, %v3158_v22  ;;  %vm840_vm5 = vcmp.ge.f32.partialorder %v519_v42, %v3162_v25 }
  0xd0   : > { %2696 = vmatprep.subr.msk.bf16.mxu1 %vm2695_vm9, %v2936_v26  ;;  %v529_v45 = vpop.permute.xlu1 %528  ;;  %vm2569_vm13 = vmpackc.low %vm830_vm8, %vm826_vm6  ;;  %v524_v46 = vpop.permute.xlu0 %523 }
  0xd1   : > { %2570 = vmatpush1.bf16.msk.msra.mxu0 %vm2569_vm13, %v2936_v26  ;;  %vm2697_vm0 = vmpackc.low %vm832_vm12, %vm828_vm7  ;;  %vm843_vm8 = vcmp.ge.f32.partialorder %v524_v46, %v3152_v20  ;;  %vm847_vm9 = vcmp.ge.f32.partialorder %v529_v45, %v3152_v20  ;;  %vm845_vm12 = vcmp.ge.f32.partialorder %v524_v46, %v3155_v21  ;;  %vm842_vm13 = vcmp.ge.f32.partialorder %v524_v46, %v3158_v22 }
  0xd2   : > { %2698 = vmatpush1.bf16.msk.msra.mxu1 %vm2697_vm0, %v2936_v26  ;;  %vm2571_vm3 = vmpackc.low %vm839_vm11, %vm835_vm10  ;;  %vm849_vm10 = vcmp.ge.f32.partialorder %v529_v45, %v3155_v21  ;;  %vm844_vm0 = vcmp.ge.f32.partialorder %v524_v46, %v3162_v25 }
  0xd3   : > { %2572 = vmatprep.subr.msk.bf16.mxu0 %vm2571_vm3, %v2936_v26  ;;  %vm2699_vm6 = vmpackc.low %vm841_vm15, %vm837_vm14  ;;  %vm846_vm14 = vcmp.ge.f32.partialorder %v529_v45, %v3158_v22  ;;  %vm848_vm3 = vcmp.ge.f32.partialorder %v529_v45, %v3162_v25 }
  0xd4   : > { %2700 = vmatprep.subr.msk.bf16.mxu1 %vm2699_vm6, %v2936_v26  ;;  %v539_v47 = vpop.permute.xlu1 %538  ;;  %vm2573_vm7 = vmpackc.low %vm838_vm2, %vm834_vm1  ;;  %v534_v48 = vpop.permute.xlu0 %533 }
  0xd5   : > { %2574 = vmatpush1.bf16.msk.msra.mxu0 %vm2573_vm7, %v2936_v26  ;;  %vm2701_vm11 = vmpackc.low %vm840_vm5, %vm836_vm4  ;;  %vm851_vm2 = vcmp.ge.f32.partialorder %v534_v48, %v3152_v20  ;;  %vm855_vm6 = vcmp.ge.f32.partialorder %v539_v47, %v3152_v20  ;;  %vm853_vm5 = vcmp.ge.f32.partialorder %v534_v48, %v3155_v21  ;;  %vm850_vm7 = vcmp.ge.f32.partialorder %v534_v48, %v3158_v22 }
  0xd6   : > { %2702 = vmatpush1.bf16.msk.msra.mxu1 %vm2701_vm11, %v2936_v26  ;;  %vm2575_vm15 = vmpackc.low %vm847_vm9, %vm843_vm8  ;;  %vm857_vm8 = vcmp.ge.f32.partialorder %v539_v47, %v3155_v21  ;;  %vm852_vm11 = vcmp.ge.f32.partialorder %v534_v48, %v3162_v25 }
  0xd7   : > { %2576 = vmatprep.subr.msk.bf16.mxu0 %vm2575_vm15, %v2936_v26  ;;  %vm2703_vm1 = vmpackc.low %vm849_vm10, %vm845_vm12  ;;  %vm854_vm12 = vcmp.ge.f32.partialorder %v539_v47, %v3158_v22  ;;  %vm856_vm15 = vcmp.ge.f32.partialorder %v539_v47, %v3162_v25 }
  0xd8   : > { %2704 = vmatprep.subr.msk.bf16.mxu1 %vm2703_vm1, %v2936_v26  ;;  %v549_v49 = vpop.permute.xlu1 %548  ;;  %vm2577_vm4 = vmpackc.low %vm846_vm14, %vm842_vm13  ;;  %v544_v53 = vpop.permute.xlu0 %543 }
  0xd9   : > { %2578 = vmatpush1.bf16.msk.msra.mxu0 %vm2577_vm4, %v2936_v26  ;;  %vm2705_vm9 = vmpackc.low %vm848_vm3, %vm844_vm0  ;;  %vm859_vm14 = vcmp.ge.f32.partialorder %v544_v53, %v3152_v20  ;;  %vm863_vm1 = vcmp.ge.f32.partialorder %v549_v49, %v3152_v20  ;;  %vm861_vm3 = vcmp.ge.f32.partialorder %v544_v53, %v3155_v21  ;;  %vm858_vm4 = vcmp.ge.f32.partialorder %v544_v53, %v3158_v22 }
  0xda   : > { %2706 = vmatpush1.bf16.msk.msra.mxu1 %vm2705_vm9, %v2936_v26  ;;  %vm2579_vm10 = vmpackc.low %vm855_vm6, %vm851_vm2  ;;  %vm865_vm2 = vcmp.ge.f32.partialorder %v549_v49, %v3155_v21  ;;  %vm860_vm9 = vcmp.ge.f32.partialorder %v544_v53, %v3162_v25  ;;  %v1658_v53 = vld [vmem:[#allocation2] sm:$0xff] }
  0xdb   : > { %2580 = vmatprep.subr.msk.bf16.mxu0 %vm2579_vm10, %v2936_v26  ;;  %vm2707_vm13 = vmpackc.low %vm857_vm8, %vm853_vm5  ;;  %vm862_vm5 = vcmp.ge.f32.partialorder %v549_v49, %v3158_v22  ;;  %vm864_vm10 = vcmp.ge.f32.partialorder %v549_v49, %v3162_v25 }
  0xdc   : > { %2708 = vmatprep.subr.msk.bf16.mxu1 %vm2707_vm13, %v2936_v26  ;;  %v559_v54 = vpop.permute.xlu1 %558  ;;  %vm2581_vm0 = vmpackc.low %vm854_vm12, %vm850_vm7  ;;  %v554_v55 = vpop.permute.xlu0 %553 }
  0xdd   : > { %2582 = vmatpush1.bf16.msk.msra.mxu0 %vm2581_vm0, %v2936_v26  ;;  %vm2709_vm6 = vmpackc.low %vm856_vm15, %vm852_vm11  ;;  %vm867_vm12 = vcmp.ge.f32.partialorder %v554_v55, %v3152_v20  ;;  %vm871_vm13 = vcmp.ge.f32.partialorder %v559_v54, %v3152_v20  ;;  %vm869_vm15 = vcmp.ge.f32.partialorder %v554_v55, %v3155_v21  ;;  %vm866_vm0 = vcmp.ge.f32.partialorder %v554_v55, %v3158_v22 }
  0xde   : > { %2710 = vmatpush1.bf16.msk.msra.mxu1 %vm2709_vm6, %v2936_v26  ;;  %vm2583_vm8 = vmpackc.low %vm863_vm1, %vm859_vm14  ;;  %vm873_vm14 = vcmp.ge.f32.partialorder %v559_v54, %v3155_v21  ;;  %vm868_vm6 = vcmp.ge.f32.partialorder %v554_v55, %v3162_v25 }
  0xdf   : > { %2584 = vmatprep.subr.msk.bf16.mxu0 %vm2583_vm8, %v2936_v26  ;;  %vm2711_vm7 = vmpackc.low %vm865_vm2, %vm861_vm3  ;;  %vm870_vm3 = vcmp.ge.f32.partialorder %v559_v54, %v3158_v22  ;;  %vm872_vm8 = vcmp.ge.f32.partialorder %v559_v54, %v3162_v25 }
  0xe0   : > { %2712 = vmatprep.subr.msk.bf16.mxu1 %vm2711_vm7, %v2936_v26  ;;  %v569_v56 = vpop.permute.xlu1 %568  ;;  %vm2585_vm11 = vmpackc.low %vm862_vm5, %vm858_vm4  ;;  %v564_v57 = vpop.permute.xlu0 %563 }
  0xe1   : > { %2586 = vmatpush1.bf16.msk.msra.mxu0 %vm2585_vm11, %v2936_v26  ;;  %vm2713_vm1 = vmpackc.low %vm864_vm10, %vm860_vm9  ;;  %vm875_vm5 = vcmp.ge.f32.partialorder %v564_v57, %v3152_v20  ;;  %vm879_vm7 = vcmp.ge.f32.partialorder %v569_v56, %v3152_v20  ;;  %vm877_vm10 = vcmp.ge.f32.partialorder %v564_v57, %v3155_v21  ;;  %vm874_vm11 = vcmp.ge.f32.partialorder %v564_v57, %v3158_v22 }
  0xe2   : > { %2714 = vmatpush1.bf16.msk.msra.mxu1 %vm2713_vm1, %v2936_v26  ;;  %vm2587_vm2 = vmpackc.low %vm871_vm13, %vm867_vm12  ;;  %vm881_vm12 = vcmp.ge.f32.partialorder %v569_v56, %v3155_v21  ;;  %vm876_vm1 = vcmp.ge.f32.partialorder %v564_v57, %v3162_v25 }
  0xe3   : > { %2588 = vmatprep.subr.msk.bf16.mxu0 %vm2587_vm2, %v2936_v26  ;;  %vm2715_vm4 = vmpackc.low %vm873_vm14, %vm869_vm15  ;;  %vm878_vm15 = vcmp.ge.f32.partialorder %v569_v56, %v3158_v22  ;;  %vm880_vm2 = vcmp.ge.f32.partialorder %v569_v56, %v3162_v25  ;;  %v1901_v56 = vld [vmem:[#allocation3] sm:$0x1] (!%p2791_p12) }
  0xe4   : > { %2716 = vmatprep.subr.msk.bf16.mxu1 %vm2715_vm4, %v2936_v26  ;;  %v579_v58 = vpop.permute.xlu1 %578  ;;  %vm2589_vm9 = vmpackc.low %vm870_vm3, %vm866_vm0  ;;  %v574_v59 = vpop.permute.xlu0 %573 }
  0xe5   : > { %2590 = vmatpush1.bf16.msk.msra.mxu0 %vm2589_vm9, %v2936_v26  ;;  %vm2717_vm13 = vmpackc.low %vm872_vm8, %vm868_vm6  ;;  %vm883_vm3 = vcmp.ge.f32.partialorder %v574_v59, %v3152_v20  ;;  %vm887_vm4 = vcmp.ge.f32.partialorder %v579_v58, %v3152_v20  ;;  %vm885_vm8 = vcmp.ge.f32.partialorder %v574_v59, %v3155_v21  ;;  %vm882_vm9 = vcmp.ge.f32.partialorder %v574_v59, %v3158_v22 }
  0xe6   : > { %2718 = vmatpush1.bf16.msk.msra.mxu1 %vm2717_vm13, %v2936_v26  ;;  %vm2591_vm14 = vmpackc.low %vm879_vm7, %vm875_vm5  ;;  %vm889_vm5 = vcmp.ge.f32.partialorder %v579_v58, %v3155_v21  ;;  %vm884_vm13 = vcmp.ge.f32.partialorder %v574_v59, %v3162_v25 }
  0xe7   : > { %2592 = vmatprep.subr.msk.bf16.mxu0 %vm2591_vm14, %v2936_v26  ;;  %vm2719_vm0 = vmpackc.low %vm881_vm12, %vm877_vm10  ;;  %vm886_vm10 = vcmp.ge.f32.partialorder %v579_v58, %v3158_v22  ;;  %vm888_vm14 = vcmp.ge.f32.partialorder %v579_v58, %v3162_v25  ;;  %v2938_v58 = vmov (!%p2791_p12), 0  }
  0xe8   : > { %2720 = vmatprep.subr.msk.bf16.mxu1 %vm2719_vm0, %v2936_v26  ;;  %v589_v60 = vpop.permute.xlu1 %588  ;;  %vm2593_vm6 = vmpackc.low %vm878_vm15, %vm874_vm11  ;;  %v584_v61 = vpop.permute.xlu0 %583  ;;  %2861 = vset.pattern.permute.xlu0 (!%p2791_p12), %v2938_v58 }
  0xe9   : > { %2594 = vmatpush1.bf16.msk.msra.mxu0 %vm2593_vm6, %v2936_v26  ;;  %vm2721_vm7 = vmpackc.low %vm880_vm2, %vm876_vm1  ;;  %vm891_vm15 = vcmp.ge.f32.partialorder %v584_v61, %v3152_v20  ;;  %vm895_vm0 = vcmp.ge.f32.partialorder %v589_v60, %v3152_v20  ;;  %vm893_vm2 = vcmp.ge.f32.partialorder %v584_v61, %v3155_v21  ;;  %vm890_vm6 = vcmp.ge.f32.partialorder %v584_v61, %v3158_v22 }
  0xea   : > { %2722 = vmatpush1.bf16.msk.msra.mxu1 %vm2721_vm7, %v2936_v26  ;;  %vm2595_vm12 = vmpackc.low %vm887_vm4, %vm883_vm3  ;;  %vm897_vm3 = vcmp.ge.f32.partialorder %v589_v60, %v3155_v21  ;;  %vm894_vm4 = vcmp.ge.f32.partialorder %v589_v60, %v3158_v22  ;;  %vm892_vm7 = vcmp.ge.f32.partialorder %v584_v61, %v3162_v25  ;;  %1938 = vperm.xlu0 (!%p2791_p12), %2861, %v1901_v56  }
  0xeb   : > { %2596 = vmatprep.subr.msk.bf16.mxu0 %vm2595_vm12, %v2936_v26  ;;  %vm2723_vm11 = vmpackc.low %vm889_vm5, %vm885_vm8  ;;  %vm896_vm5 = vcmp.ge.f32.partialorder %v589_v60, %v3162_v25  ;;  %v1949_v60 = vld [vmem:[#allocation4] sm:$0x1] (!%p2791_p12) }
  0xec   : > { %2724 = vmatprep.subr.msk.bf16.mxu1 %vm2723_vm11, %v2936_v26  ;;  %v599_v62 = vpop.permute.xlu1 %598  ;;  %vm2597_vm1 = vmpackc.low %vm886_vm10, %vm882_vm9  ;;  %v594_v63 = vpop.permute.xlu0 %593 }
  0xed   : > { %2598 = vmatpush1.bf16.msk.msra.mxu0 %vm2597_vm1, %v2936_v26  ;;  %vm2725_vm8 = vmpackc.low %vm888_vm14, %vm884_vm13  ;;  %vm899_vm12 = vcmp.ge.f32.partialorder %v594_v63, %v3152_v20  ;;  %vm903_vm11 = vcmp.ge.f32.partialorder %v599_v62, %v3152_v20  ;;  %vm901_vm14 = vcmp.ge.f32.partialorder %v594_v63, %v3155_v21  ;;  %vm898_vm1 = vcmp.ge.f32.partialorder %v594_v63, %v3158_v22 }
  0xee   : > { %2726 = vmatpush1.bf16.msk.msra.mxu1 %vm2725_vm8, %v2936_v26  ;;  %vm2599_vm9 = vmpackc.low %vm895_vm0, %vm891_vm15  ;;  %vm905_vm15 = vcmp.ge.f32.partialorder %v599_v62, %v3155_v21  ;;  %vm902_vm0 = vcmp.ge.f32.partialorder %v599_v62, %v3158_v22  ;;  %1985 = vperm.xlu0 (!%p2791_p12), %2861, %v1949_v60  }
  0xef   : > { %2600 = vmatprep.subr.msk.bf16.mxu0 %vm2599_vm9, %v2936_v26  ;;  %vm2727_vm10 = vmpackc.low %vm897_vm3, %vm893_vm2  ;;  %vm904_vm3 = vcmp.ge.f32.partialorder %v599_v62, %v3162_v25  ;;  %v1890_v62 = vstv (!%p2791_p12), %s1889_s17 }
  0xf0   : > { %2728 = vmatprep.subr.msk.bf16.mxu1 %vm2727_vm10, %v2936_v26  ;;  %v609_v1 = vpop.permute.xlu1 %608  ;;  %1722 = vmatmul.mubr.bf16.vlgmr.msra.gmra.mrb[0].mxu0 %v3108_v52  ;;  %vm2601_vm13 = vmpackc.low %vm894_vm4, %vm890_vm6  ;;  %v604_v2 = vpop.permute.xlu0 %603  ;;  %vm900_vm4 = vcmp.ge.f32.partialorder %v594_v63, %v3162_v25 }
  0xf1   : > { %2602 = vmatpush1.bf16.msk.msra.mxu0 %vm2601_vm13, %v2936_v26  ;;  %1804 = vmatmul.mubr.bf16.vlgmr.msra.gmra.mrb[0].mxu1 %v3108_v52  ;;  %vm2729_vm2 = vmpackc.low %vm896_vm5, %vm892_vm7  ;;  %vm907_vm9 = vcmp.ge.f32.partialorder %v604_v2, %v3152_v20  ;;  %vm911_vm10 = vcmp.ge.f32.partialorder %v609_v1, %v3152_v20  ;;  %vm909_vm7 = vcmp.ge.f32.partialorder %v604_v2, %v3155_v21 }
  0xf2   : > { %2730 = vmatpush1.bf16.msk.msra.mxu1 %vm2729_vm2, %v2936_v26  ;;  %vm2603_vm6 = vmpackc.low %vm903_vm11, %vm899_vm12  ;;  %1762 = vmatprep.mubr.bf16.mxu0 %v1684_v0  ;;  %vm913_vm12 = vcmp.ge.f32.partialorder %v609_v1, %v3155_v21  ;;  %vm910_vm11 = vcmp.ge.f32.partialorder %v609_v1, %v3158_v22  ;;  %vm906_vm13 = vcmp.ge.f32.partialorder %v604_v2, %v3158_v22 }
  0xf3   : > { %2604 = vmatprep.subr.msk.bf16.mxu0 %vm2603_vm6, %v2936_v26  ;;  %vm2731_vm8 = vmpackc.low %vm905_vm15, %vm901_vm14  ;;  %1844 = vmatprep.mubr.bf16.mxu1 %v1684_v0  ;;  %vm912_vm15 = vcmp.ge.f32.partialorder %v609_v1, %v3162_v25  ;;  %v1917_v0 = vsub.s32 (!%p2791_p12), 7, %v3092_v44  ;;  %v1887_v1 = vstv (!%p2791_p12), %s1886_s18 }
  0xf4   : > { %2732 = vmatprep.subr.msk.bf16.mxu1 %vm2731_vm8, %v2936_v26  ;;  %v619_v51 = vpop.permute.xlu1 %618  ;;  %vm2605_vm5 = vmpackc.low %vm902_vm0, %vm898_vm1  ;;  %v614_v3 = vpop.permute.xlu0 %613  ;;  %vm908_vm0 = vcmp.ge.f32.partialorder %v604_v2, %v3162_v25 }
  0xf5   : > { %2606 = vmatpush1.bf16.msk.msra.mxu0 %vm2605_vm5, %v2936_v26  ;;  %vm2733_vm14 = vmpackc.low %vm904_vm3, %vm900_vm4  ;;  %vm915_vm6 = vcmp.ge.f32.partialorder %v614_v3, %v3152_v20  ;;  %vm919_vm8 = vcmp.ge.f32.partialorder %v619_v51, %v3152_v20  ;;  %vm917_vm4 = vcmp.ge.f32.partialorder %v614_v3, %v3155_v21  ;;  %vm921_vm5 = vcmp.ge.f32.partialorder %v619_v51, %v3155_v21 }
  0xf6   : > { %2734 = vmatpush1.bf16.msk.msra.mxu1 %vm2733_vm14, %v2936_v26  ;;  %vm2607_vm1 = vmpackc.low %vm911_vm10, %vm907_vm9  ;;  %vm918_vm14 = vcmp.ge.f32.partialorder %v619_v51, %v3158_v22  ;;  %vm914_vm9 = vcmp.ge.f32.partialorder %v614_v3, %v3158_v22 }
  0xf7   : > { %2608 = vmatprep.subr.msk.bf16.mxu0 %vm2607_vm1, %v2936_v26  ;;  %vm2735_vm2 = vmpackc.low %vm913_vm12, %vm909_vm7  ;;  %vm920_vm7 = vcmp.ge.f32.partialorder %v619_v51, %v3162_v25  ;;  %vm916_vm12 = vcmp.ge.f32.partialorder %v614_v3, %v3162_v25 }
  0xf8   : > { %2736 = vmatprep.subr.msk.bf16.mxu1 %vm2735_vm2, %v2936_v26  ;;  %v629_v4 = vpop.permute.xlu1 %628  ;;  %vm2609_vm3 = vmpackc.low %vm910_vm11, %vm906_vm13  ;;  %v624_v5 = vpop.permute.xlu0 %623 }
  0xf9   : > { %2610 = vmatpush1.bf16.msk.msra.mxu0 %vm2609_vm3, %v2936_v26  ;;  %vm2737_vm10 = vmpackc.low %vm912_vm15, %vm908_vm0  ;;  %vm923_vm1 = vcmp.ge.f32.partialorder %v624_v5, %v3152_v20  ;;  %vm927_vm2 = vcmp.ge.f32.partialorder %v629_v4, %v3152_v20  ;;  %vm925_vm0 = vcmp.ge.f32.partialorder %v624_v5, %v3155_v21  ;;  %vm929_vm3 = vcmp.ge.f32.partialorder %v629_v4, %v3155_v21 }
  0xfa   : > { %2738 = vmatpush1.bf16.msk.msra.mxu1 %vm2737_vm10, %v2936_v26  ;;  %vm2611_vm11 = vmpackc.low %vm919_vm8, %vm915_vm6  ;;  %vm926_vm10 = vcmp.ge.f32.partialorder %v629_v4, %v3158_v22  ;;  %vm922_vm6 = vcmp.ge.f32.partialorder %v624_v5, %v3158_v22 }
  0xfb   : > { %2612 = vmatprep.subr.msk.bf16.mxu0 %vm2611_vm11, %v2936_v26  ;;  %vm2739_vm13 = vmpackc.low %vm921_vm5, %vm917_vm4  ;;  %vm928_vm4 = vcmp.ge.f32.partialorder %v629_v4, %v3162_v25  ;;  %vm924_vm5 = vcmp.ge.f32.partialorder %v624_v5, %v3162_v25 }
  0xfc   : > { %2740 = vmatprep.subr.msk.bf16.mxu1 %vm2739_vm13, %v2936_v26  ;;  %v639_v6 = vpop.permute.xlu1 %638  ;;  %vm2613_vm15 = vmpackc.low %vm918_vm14, %vm914_vm9  ;;  %v634_v7 = vpop.permute.xlu0 %633 }
  0xfd   : > { %2614 = vmatpush1.bf16.msk.msra.mxu0 %vm2613_vm15, %v2936_v26  ;;  %vm2741_vm8 = vmpackc.low %vm920_vm7, %vm916_vm12  ;;  %vm931_vm11 = vcmp.ge.f32.partialorder %v634_v7, %v3152_v20  ;;  %vm935_vm13 = vcmp.ge.f32.partialorder %v639_v6, %v3152_v20  ;;  %vm933_vm12 = vcmp.ge.f32.partialorder %v634_v7, %v3155_v21  ;;  %vm937_vm15 = vcmp.ge.f32.partialorder %v639_v6, %v3155_v21 }
  0xfe   : > { %2742 = vmatpush1.bf16.msk.msra.mxu1 %vm2741_vm8, %v2936_v26  ;;  %vm2615_vm14 = vmpackc.low %vm927_vm2, %vm923_vm1  ;;  %vm934_vm8 = vcmp.ge.f32.partialorder %v639_v6, %v3158_v22  ;;  %vm930_vm1 = vcmp.ge.f32.partialorder %v634_v7, %v3158_v22 }
  0xff   : > { %2616 = vmatprep.subr.msk.bf16.mxu0 %vm2615_vm14, %v2936_v26  ;;  %vm2743_vm9 = vmpackc.low %vm929_vm3, %vm925_vm0  ;;  %vm936_vm0 = vcmp.ge.f32.partialorder %v639_v6, %v3162_v25  ;;  %vm932_vm3 = vcmp.ge.f32.partialorder %v634_v7, %v3162_v25 }
 0x100   : > { %2744 = vmatprep.subr.msk.bf16.mxu1 %vm2743_vm9, %v2936_v26  ;;  %v649_v8 = vpop.permute.xlu1 %648  ;;  %vm2617_vm7 = vmpackc.low %vm926_vm10, %vm922_vm6  ;;  %v644_v9 = vpop.permute.xlu0 %643 }
 0x101   : > { %2618 = vmatpush1.bf16.msk.msra.mxu0 %vm2617_vm7, %v2936_v26  ;;  %vm2745_vm2 = vmpackc.low %vm928_vm4, %vm924_vm5  ;;  %vm939_vm14 = vcmp.ge.f32.partialorder %v644_v9, %v3152_v20  ;;  %vm943_vm9 = vcmp.ge.f32.partialorder %v649_v8, %v3152_v20  ;;  %vm941_vm5 = vcmp.ge.f32.partialorder %v644_v9, %v3155_v21  ;;  %vm945_vm7 = vcmp.ge.f32.partialorder %v649_v8, %v3155_v21 }
 0x102   : > { %2746 = vmatpush1.bf16.msk.msra.mxu1 %vm2745_vm2, %v2936_v26  ;;  %vm2619_vm10 = vmpackc.low %vm935_vm13, %vm931_vm11  ;;  %vm942_vm2 = vcmp.ge.f32.partialorder %v649_v8, %v3158_v22  ;;  %vm938_vm11 = vcmp.ge.f32.partialorder %v644_v9, %v3158_v22 }
 0x103   : > { %2620 = vmatprep.subr.msk.bf16.mxu0 %vm2619_vm10, %v2936_v26  ;;  %vm2747_vm6 = vmpackc.low %vm937_vm15, %vm933_vm12  ;;  %vm944_vm12 = vcmp.ge.f32.partialorder %v649_v8, %v3162_v25  ;;  %vm940_vm15 = vcmp.ge.f32.partialorder %v644_v9, %v3162_v25  ;;  %v1965_v8 = vsub.s32 (!%p2791_p12), 6, %v3092_v44 }
 0x104   : > { %2748 = vmatprep.subr.msk.bf16.mxu1 %vm2747_vm6, %v2936_v26  ;;  %v659_v10 = vpop.permute.xlu1 %658  ;;  %vm2621_vm4 = vmpackc.low %vm934_vm8, %vm930_vm1  ;;  %v654_v11 = vpop.permute.xlu0 %653 }
 0x105   : > { %2622 = vmatpush1.bf16.msk.msra.mxu0 %vm2621_vm4, %v2936_v26  ;;  %vm2749_vm13 = vmpackc.low %vm936_vm0, %vm932_vm3  ;;  %vm947_vm10 = vcmp.ge.f32.partialorder %v654_v11, %v3152_v20  ;;  %vm951_vm6 = vcmp.ge.f32.partialorder %v659_v10, %v3152_v20  ;;  %vm949_vm3 = vcmp.ge.f32.partialorder %v654_v11, %v3155_v21  ;;  %vm953_vm4 = vcmp.ge.f32.partialorder %v659_v10, %v3155_v21 }
 0x106   : > { %2750 = vmatpush1.bf16.msk.msra.mxu1 %vm2749_vm13, %v2936_v26  ;;  %vm2623_vm8 = vmpackc.low %vm943_vm9, %vm939_vm14  ;;  %vm950_vm13 = vcmp.ge.f32.partialorder %v659_v10, %v3158_v22  ;;  %vm946_vm14 = vcmp.ge.f32.partialorder %v654_v11, %v3158_v22 }
 0x107   : > { %2624 = vmatprep.subr.msk.bf16.mxu0 %vm2623_vm8, %v2936_v26  ;;  %vm2751_vm1 = vmpackc.low %vm945_vm7, %vm941_vm5  ;;  %vm952_vm5 = vcmp.ge.f32.partialorder %v659_v10, %v3162_v25  ;;  %vm948_vm7 = vcmp.ge.f32.partialorder %v654_v11, %v3162_v25  ;;  %v1913_v10 = vsub.s32 (!%p2791_p12), 5, %v3092_v44 }
 0x108   : > { %2752 = vmatprep.subr.msk.bf16.mxu1 %vm2751_vm1, %v2936_v26  ;;  %v669_v12 = vpop.permute.xlu1 %668  ;;  %vm2625_vm0 = vmpackc.low %vm942_vm2, %vm938_vm11  ;;  %v664_v14 = vpop.permute.xlu0 %663 }
 0x109   : > { %2626 = vmatpush1.bf16.msk.msra.mxu0 %vm2625_vm0, %v2936_v26  ;;  %vm2753_vm9 = vmpackc.low %vm944_vm12, %vm940_vm15  ;;  %vm955_vm8 = vcmp.ge.f32.partialorder %v664_v14, %v3152_v20  ;;  %vm959_vm1 = vcmp.ge.f32.partialorder %v669_v12, %v3152_v20  ;;  %vm957_vm15 = vcmp.ge.f32.partialorder %v664_v14, %v3155_v21  ;;  %vm961_vm0 = vcmp.ge.f32.partialorder %v669_v12, %v3155_v21 }
 0x10a   : > { %2754 = vmatpush1.bf16.msk.msra.mxu1 %vm2753_vm9, %v2936_v26  ;;  %vm2627_vm2 = vmpackc.low %vm951_vm6, %vm947_vm10  ;;  %vm958_vm9 = vcmp.ge.f32.partialorder %v669_v12, %v3158_v22  ;;  %vm954_vm10 = vcmp.ge.f32.partialorder %v664_v14, %v3158_v22 }
 0x10b   : > { %2628 = vmatprep.subr.msk.bf16.mxu0 %vm2627_vm2, %v2936_v26  ;;  %vm2755_vm11 = vmpackc.low %vm953_vm4, %vm949_vm3  ;;  %vm960_vm3 = vcmp.ge.f32.partialorder %v669_v12, %v3162_v25  ;;  %vm956_vm4 = vcmp.ge.f32.partialorder %v664_v14, %v3162_v25  ;;  %v1961_v14 = vsub.s32 (!%p2791_p12), 4, %v3092_v44 }
 0x10c   : > { %2756 = vmatprep.subr.msk.bf16.mxu1 %vm2755_vm11, %v2936_v26  ;;  %v679_v17 = vpop.permute.xlu1 %678  ;;  %vm2629_vm12 = vmpackc.low %vm950_vm13, %vm946_vm14  ;;  %v674_v18 = vpop.permute.xlu0 %673 }
 0x10d   : > { %2630 = vmatpush1.bf16.msk.msra.mxu0 %vm2629_vm12, %v2936_v26  ;;  %vm2757_vm6 = vmpackc.low %vm952_vm5, %vm948_vm7  ;;  %vm963_vm2 = vcmp.ge.f32.partialorder %v674_v18, %v3152_v20  ;;  %vm967_vm11 = vcmp.ge.f32.partialorder %v679_v17, %v3152_v20  ;;  %vm965_vm7 = vcmp.ge.f32.partialorder %v674_v18, %v3155_v21  ;;  %vm969_vm12 = vcmp.ge.f32.partialorder %v679_v17, %v3155_v21 }
 0x10e   : > { %2758 = vmatpush1.bf16.msk.msra.mxu1 %vm2757_vm6, %v2936_v26  ;;  %vm2631_vm13 = vmpackc.low %vm959_vm1, %vm955_vm8  ;;  %vm966_vm6 = vcmp.ge.f32.partialorder %v679_v17, %v3158_v22  ;;  %vm962_vm8 = vcmp.ge.f32.partialorder %v674_v18, %v3158_v22 }
 0x10f   : > { %2632 = vmatprep.subr.msk.bf16.mxu0 %vm2631_vm13, %v2936_v26  ;;  %vm2759_vm14 = vmpackc.low %vm961_vm0, %vm957_vm15  ;;  %vm968_vm15 = vcmp.ge.f32.partialorder %v679_v17, %v3162_v25  ;;  %vm964_vm0 = vcmp.ge.f32.partialorder %v674_v18, %v3162_v25 }
 0x110   : > { %2760 = vmatprep.subr.msk.bf16.mxu1 %vm2759_vm14, %v2936_v26  ;;  %v689_v23 = vpop.permute.xlu1 %688  ;;  %vm2633_vm5 = vmpackc.low %vm958_vm9, %vm954_vm10  ;;  %v684_v24 = vpop.permute.xlu0 %683 }
 0x111   : > { %2634 = vmatpush1.bf16.msk.msra.mxu0 %vm2633_vm5, %v2936_v26  ;;  %vm2761_vm1 = vmpackc.low %vm960_vm3, %vm956_vm4  ;;  %vm971_vm13 = vcmp.ge.f32.partialorder %v684_v24, %v3152_v20  ;;  %vm975_vm14 = vcmp.ge.f32.partialorder %v689_v23, %v3152_v20  ;;  %vm973_vm4 = vcmp.ge.f32.partialorder %v684_v24, %v3155_v21  ;;  %vm977_vm5 = vcmp.ge.f32.partialorder %v689_v23, %v3155_v21 }
 0x112   : > { %2762 = vmatpush1.bf16.msk.msra.mxu1 %vm2761_vm1, %v2936_v26  ;;  %vm2635_vm9 = vmpackc.low %vm967_vm11, %vm963_vm2  ;;  %vm974_vm1 = vcmp.ge.f32.partialorder %v689_v23, %v3158_v22  ;;  %vm970_vm2 = vcmp.ge.f32.partialorder %v684_v24, %v3158_v22 }
 0x113   : > { %2636 = vmatprep.subr.msk.bf16.mxu0 %vm2635_vm9, %v2936_v26  ;;  %vm2763_vm10 = vmpackc.low %vm969_vm12, %vm965_vm7  ;;  %vm976_vm7 = vcmp.ge.f32.partialorder %v689_v23, %v3162_v25  ;;  %vm972_vm12 = vcmp.ge.f32.partialorder %v684_v24, %v3162_v25 }
 0x114   : > { %2764 = vmatprep.subr.msk.bf16.mxu1 %vm2763_vm10, %v2936_v26  ;;  %v699_v27 = vpop.permute.xlu1 %698  ;;  %vm2637_vm3 = vmpackc.low %vm966_vm6, %vm962_vm8  ;;  %v694_v28 = vpop.permute.xlu0 %693 }
 0x115   : > { %2638 = vmatpush1.bf16.msk.msra.mxu0 %vm2637_vm3, %v2936_v26  ;;  %vm2765_vm11 = vmpackc.low %vm968_vm15, %vm964_vm0  ;;  %vm979_vm9 = vcmp.ge.f32.partialorder %v694_v28, %v3152_v20  ;;  %vm983_vm10 = vcmp.ge.f32.partialorder %v699_v27, %v3152_v20  ;;  %vm981_vm0 = vcmp.ge.f32.partialorder %v694_v28, %v3155_v21  ;;  %vm985_vm3 = vcmp.ge.f32.partialorder %v699_v27, %v3155_v21 }
 0x116   : > { %2766 = vmatpush1.bf16.msk.msra.mxu1 %vm2765_vm11, %v2936_v26  ;;  %vm2639_vm6 = vmpackc.low %vm975_vm14, %vm971_vm13  ;;  %vm982_vm11 = vcmp.ge.f32.partialorder %v699_v27, %v3158_v22  ;;  %vm978_vm13 = vcmp.ge.f32.partialorder %v694_v28, %v3158_v22 }
 0x117   : > { %2640 = vmatprep.subr.msk.bf16.mxu0 %vm2639_vm6, %v2936_v26  ;;  %vm2767_vm8 = vmpackc.low %vm977_vm5, %vm973_vm4  ;;  %vm984_vm4 = vcmp.ge.f32.partialorder %v699_v27, %v3162_v25  ;;  %vm980_vm5 = vcmp.ge.f32.partialorder %v694_v28, %v3162_v25 }
 0x118   : > { %2768 = vmatprep.subr.msk.bf16.mxu1 %vm2767_vm8, %v2936_v26  ;;  %v709_v29 = vpop.permute.xlu1 %708  ;;  %vm2641_vm15 = vmpackc.low %vm974_vm1, %vm970_vm2  ;;  %v704_v30 = vpop.permute.xlu0 %703 }
 0x119   : > { %2642 = vmatpush1.bf16.msk.msra.mxu0 %vm2641_vm15, %v2936_v26  ;;  %vm2769_vm14 = vmpackc.low %vm976_vm7, %vm972_vm12  ;;  %vm987_vm6 = vcmp.ge.f32.partialorder %v704_v30, %v3152_v20  ;;  %vm991_vm8 = vcmp.ge.f32.partialorder %v709_v29, %v3152_v20  ;;  %vm989_vm12 = vcmp.ge.f32.partialorder %v704_v30, %v3155_v21  ;;  %vm993_vm15 = vcmp.ge.f32.partialorder %v709_v29, %v3155_v21 }
 0x11a   : > { %2770 = vmatpush1.bf16.msk.msra.mxu1 %vm2769_vm14, %v2936_v26  ;;  %vm2643_vm1 = vmpackc.low %vm983_vm10, %vm979_vm9  ;;  %vm990_vm14 = vcmp.ge.f32.partialorder %v709_v29, %v3158_v22  ;;  %vm986_vm9 = vcmp.ge.f32.partialorder %v704_v30, %v3158_v22 }
 0x11b   : > { %2644 = vmatprep.subr.msk.bf16.mxu0 %vm2643_vm1, %v2936_v26  ;;  %vm2771_vm2 = vmpackc.low %vm985_vm3, %vm981_vm0  ;;  %vm992_vm0 = vcmp.ge.f32.partialorder %v709_v29, %v3162_v25  ;;  %vm988_vm3 = vcmp.ge.f32.partialorder %v704_v30, %v3162_v25 }
 0x11c   : > { %2772 = vmatprep.subr.msk.bf16.mxu1 %vm2771_vm2, %v2936_v26  ;;  %v719_v31 = vpop.permute.xlu1 %718  ;;  %vm2645_vm7 = vmpackc.low %vm982_vm11, %vm978_vm13  ;;  %v714_v32 = vpop.permute.xlu0 %713 }
 0x11d   : > { %2646 = vmatpush1.bf16.msk.msra.mxu0 %vm2645_vm7, %v2936_v26  ;;  %vm2773_vm10 = vmpackc.low %vm984_vm4, %vm980_vm5  ;;  %vm995_vm1 = vcmp.ge.f32.partialorder %v714_v32, %v3152_v20  ;;  %vm999_vm2 = vcmp.ge.f32.partialorder %v719_v31, %v3152_v20  ;;  %vm997_vm5 = vcmp.ge.f32.partialorder %v714_v32, %v3155_v21  ;;  %vm1001_vm7 = vcmp.ge.f32.partialorder %v719_v31, %v3155_v21 }
 0x11e   : > { %2774 = vmatpush1.bf16.msk.msra.mxu1 %vm2773_vm10, %v2936_v26  ;;  %vm2647_vm11 = vmpackc.low %vm991_vm8, %vm987_vm6  ;;  %vm998_vm10 = vcmp.ge.f32.partialorder %v719_v31, %v3158_v22  ;;  %vm994_vm6 = vcmp.ge.f32.partialorder %v714_v32, %v3158_v22 }
 0x11f   : > { %2648 = vmatprep.subr.msk.bf16.mxu0 %vm2647_vm11, %v2936_v26  ;;  %vm2775_vm13 = vmpackc.low %vm993_vm15, %vm989_vm12  ;;  %vm1000_vm12 = vcmp.ge.f32.partialorder %v719_v31, %v3162_v25  ;;  %vm996_vm15 = vcmp.ge.f32.partialorder %v714_v32, %v3162_v25 }
 0x120   : > { %2776 = vmatprep.subr.msk.bf16.mxu1 %vm2775_vm13, %v2936_v26  ;;  %v729_v33 = vpop.permute.xlu1 %728  ;;  %vm2649_vm4 = vmpackc.low %vm990_vm14, %vm986_vm9  ;;  %v724_v34 = vpop.permute.xlu0 %723 }
 0x121   : > { %2650 = vmatpush1.bf16.msk.msra.mxu0 %vm2649_vm4, %v2936_v26  ;;  %vm2777_vm8 = vmpackc.low %vm992_vm0, %vm988_vm3  ;;  %vm1003_vm11 = vcmp.ge.f32.partialorder %v724_v34, %v3152_v20  ;;  %vm1007_vm13 = vcmp.ge.f32.partialorder %v729_v33, %v3152_v20 }
 0x122   : > { %2778 = vmatpush1.bf16.msk.msra.mxu1 %vm2777_vm8, %v2936_v26  ;;  %vm2651_vm14 = vmpackc.low %vm999_vm2, %vm995_vm1  ;;  %vm1005_vm1 = vcmp.ge.f32.partialorder %v724_v34, %v3155_v21  ;;  %vm1009_vm2 = vcmp.ge.f32.partialorder %v729_v33, %v3155_v21 }
 0x123   : > { %2652 = vmatprep.subr.msk.bf16.mxu0 %vm2651_vm14, %v2936_v26  ;;  %vm2779_vm9 = vmpackc.low %vm1001_vm7, %vm997_vm5  ;;  %vm1006_vm5 = vcmp.ge.f32.partialorder %v729_v33, %v3158_v22  ;;  %vm1002_vm7 = vcmp.ge.f32.partialorder %v724_v34, %v3158_v22 }
 0x124   : > { %2780 = vmatprep.subr.msk.bf16.mxu1 %vm2779_vm9, %v2936_v26  ;;  %vm2653_vm4 = vmpackc.low %vm998_vm10, %vm994_vm6  ;;  %v739_v35 = vpop.permute.xlu1 %738  ;;  %v734_v36 = vpop.permute.xlu0 %733  ;;  %vm1008_vm10 = vcmp.ge.f32.partialorder %v729_v33, %v3162_v25  ;;  %vm1004_vm6 = vcmp.ge.f32.partialorder %v724_v34, %v3162_v25 }
 0x125   : > { %2654 = vmatpush1.bf16.msk.msra.mxu0 %vm2653_vm4, %v2936_v26  ;;  %vm2781_vm0 = vmpackc.low %vm1000_vm12, %vm996_vm15  ;;  %vm1015_vm8 = vcmp.ge.f32.partialorder %v739_v35, %v3152_v20  ;;  %vm1011_vm12 = vcmp.ge.f32.partialorder %v734_v36, %v3152_v20  ;;  %vm1017_vm14 = vcmp.ge.f32.partialorder %v739_v35, %v3155_v21  ;;  %vm1013_vm9 = vcmp.ge.f32.partialorder %v734_v36, %v3155_v21 }
 0x126   : > { %2782 = vmatpush1.bf16.msk.msra.mxu1 %vm2781_vm0, %v2936_v26  ;;  %vm2655_vm3 = vmpackc.low %vm1007_vm13, %vm1003_vm11  ;;  %vm1014_vm13 = vcmp.ge.f32.partialorder %v739_v35, %v3158_v22  ;;  %vm1010_vm4 = vcmp.ge.f32.partialorder %v734_v36, %v3158_v22  ;;  %v1683_v20 = vcombine.high %v3108_v52, %v3108_v52  ;;  %v2937_v21 = vmov 1983009808  }
 0x127   : > { %2656 = vmatprep.subr.msk.bf16.mxu0 %vm2655_vm3, %v2936_v26  ;;  %vm2783_vm15 = vmpackc.low %vm1009_vm2, %vm1005_vm1  ;;  %vm1016_vm3 = vcmp.ge.f32.partialorder %v739_v35, %v3162_v25  ;;  %vm1012_vm1 = vcmp.ge.f32.partialorder %v734_v36, %v3162_v25  ;;  %v1860_v22 = vunpack.c.l.s4 %v2937_v21 }
 0x128   : > { %2784 = vmatprep.subr.msk.bf16.mxu1 %vm2783_vm15, %v2936_v26  ;;  %vm2657_vm11 = vmpackc.low %vm1006_vm5, %vm1002_vm7 }
 0x129   : > { %2658 = vmatpush1.bf16.msk.msra.mxu0 %vm2657_vm11, %v2936_v26  ;;  %vm2785_vm0 = vmpackc.low %vm1008_vm10, %vm1004_vm6  ;;  %v1861_v25 = vunpack.c.0.s8 %v1860_v22  ;;  %vm2122_vm10 = vcmp.lt.s32.totalorder (!%p2791_p12), %v742_v39, 512  ;;  %vm2100_vm6 = vcmask (!%p2791_p12), 1040384   ;;  %vm2087_vm11 = vcmask (!%p2791_p12), 0  }
 0x12a   : > { %2786 = vmatpush1.bf16.msk.msra.mxu1 %vm2785_vm0, %v2936_v26  ;;  %vm2659_vm2 = vmpackc.low %vm1015_vm8, %vm1011_vm12  ;;  %vm2068_vm8 = vcmask (!%p2791_p12), 1041409  }
 0x12b   : > { %2660 = vmatprep.subr.msk.bf16.mxu0 %vm2659_vm2, %v2936_v26  ;;  %vm2787_vm15 = vmpackc.low %vm1017_vm14, %vm1013_vm9  ;;  %v3651_v38 = vsub.s32 %v1861_v25, %v3092_v44  ;;  %v1893_v25 = vand.u32 (!%p2791_p12), 127, %v742_v39  ;;  %vm2098_vm9 = vcmask (!%p2791_p12), 1025   ;;  %v2079_v44 = vld [vmem:[#allocation7] sm:$0x1] (!%p2791_p12) }
 0x12c   : > { %vm2661_vm5 = vmpackc.low %vm1014_vm13, %vm1010_vm4  ;;  %2788 = vmatprep.subr.msk.bf16.mxu1 %vm2787_vm15, %v2936_v26 }
 0x12d   : > { %vm2789_vm7 = vmpackc.low %vm1016_vm3, %vm1012_vm1  ;;  %2662 = vmatpush1.bf16.msk.msra.mxu0 %vm2661_vm5, %v2936_v26  ;;  %vm1931_vm12 = vcmp.lt.s32.totalorder (!%p2791_p12), %v1893_v25, 1  ;;  %vm1897_vm14 = vcmp.eq.s32.totalorder (!%p2791_p12), %v1893_v25, 0 }
 0x12e   : > { %2790 = vmatpush1.bf16.msk.msra.mxu1 %vm2789_vm7, %v2936_v26 }
 0x130   : > { %1763 = vmatmul.mubr.bf16.vlgmr.msra.gmra.mrb[0].mxu0 %v1683_v20 }
 0x131   : > { %1845 = vmatmul.mubr.bf16.vlgmr.msra.gmra.mrb[0].mxu1 %v1683_v20 }
 0x169   : > { %v1939_v21 = vpop.permute.xlu0 (!%p2791_p12), %1938 }
 0x203   : > { %v1764_v37 = vpop.f32.mrb[0].mxu0 }
 0x204   : > { %v1846_v40 = vpop.f32.mrb[0].mxu1  ;;  %v1766_v41 = vpop.f32.mrb[1].mxu0 }
 0x205   : > { %v1857_v42 = vcombine.low %v1764_v37, %v1766_v41  ;;  %v1848_v43 = vpop.f32.mrb[1].mxu1  ;;  %v1768_v45 = vpop.f32.mrb[2].mxu0 }
 0x206   : > { %v1858_v52 = vcombine.low %v1846_v40, %v1848_v43  ;;  %v1850_v46 = vpop.f32.mrb[2].mxu1  ;;  %v1769_v47 = vpop.f32.mrb[3].mxu0 }
 0x207   : > { %v1865_v48 = vrot.slane %v1857_v42, %v3651_v38  ;;  %v1851_v26 = vpop.f32.mrb[3].mxu1  ;;  %v1986_v37 = vpop.permute.xlu0 (!%p2791_p12), %1985  ;;  %v1944_v42 = vrot.slane (!%p2791_p12), %v1939_v21, %v3148_v16 }
 0x208   : > { %v1872_v49 = vrot.slane %v1858_v52, %v3651_v38  ;;  %1880 = sbr.rel (%p2791_p12) target bundleno = 844 (0x34c), region = 52 }
 0x20a   : > { %v1873_v54 = vcombine.low %v1865_v48, %v1872_v49 }
 0x20c   : > { %v1875_v55 = vadd.f32 %v1873_v54, %v1658_v53 }
 0x20e   : > { %1876 = vst [vmem:[#allocation2] sm:$0xff] %v1875_v55  ;;  %v1991_v55 = vrot.slane (!%p2791_p12), %v1986_v37, %v3148_v16 }
 0x215   : > { %v1881_v57 = vld [vmem:[#allocation2] sm:$0xff] }
 0x216   : > { %v1883_v59 = vrot.slane %v1881_v57, 7  ;;  %v3659_v2 = vmul.f32 %v1887_v1, %v1881_v57 }
 0x218   : > { %v1885_v61 = vsub.f32 %v1881_v57, %v1883_v59  ;;  %v2131_v4 = vrot.slane %v3659_v2, %v3102_v50  ;;  %v1954_v5 = vrot.slane %v3659_v2, %v3148_v16  ;;  %v1966_v9 = vrot.slane %v3659_v2, %v1965_v8 }
 0x219   : > { %v1958_v11 = vrot.slane %v3659_v2, %v752_v19  ;;  %v1962_v17 = vrot.slane %v3659_v2, %v1961_v14 }
 0x21a   : > { %v3656_v63 = vmul.f32 %v1890_v62, %v1885_v61  ;;  %2133 = vst.msk [vmem:[%s340_s26] sm:$0xf] %vm2122_vm10, %v2131_v4  ;;  %1971 = vrot.lane.b32.xlu0 %v1954_v5, %s2939_s28  ;;  %v2101_v18 = vsel %vm2100_vm6, %v1954_v5, -inf  ;;  %v2104_v27 = vsel %vm2100_vm6, %v1966_v9, -inf }
 0x21b   : > { %v2102_v23 = vsel %vm2100_vm6, %v1958_v11, -inf  ;;  %v2103_v24 = vsel %vm2100_vm6, %v1962_v17, -inf }
 0x21c   : > { %v1906_v51 = vrot.slane %v3656_v63, %v3137_v13  ;;  %v2117_v3 = vrot.slane %v3656_v63, %v3102_v50  ;;  %v1918_v7 = vrot.slane %v3656_v63, %v1917_v0  ;;  %v1910_v50 = vrot.slane %v3656_v63, %v3145_v15 }
 0x21d   : > { %v1914_v12 = vrot.slane %v3656_v63, %v1913_v10  ;;  %v2105_v28 = vmax.f32 %v2101_v18, %v2102_v23  ;;  %v2106_v29 = vmax.f32 %v2103_v24, %v2104_v27 }
 0x21e   : > { %v2118_v6 = vcombine.high %v2117_v3, %v2117_v3  ;;  %1923 = vrot.lane.b32.xlu1 %v1906_v51, %s2939_s28  ;;  %1925 = vrot.lane.b32.xlu0 %v1910_v50, %s2939_s28  ;;  %v2089_v30 = vsel %vm2068_vm8, %v1906_v51, -inf  ;;  %v2090_v31 = vsel %vm2068_vm8, %v1910_v50, -inf  ;;  %v2092_v33 = vsel %vm2068_vm8, %v1918_v7, -inf }
 0x21f   : > { %v2107_v19 = vmax.f32 %v2105_v28, %v2106_v29  ;;  %v2091_v32 = vsel %vm2068_vm8, %v1914_v12, -inf  ;;  %v2093_v34 = vmax.f32 %v2089_v30, %v2090_v31 }
 0x220   : > { %2124 = vst.msk [vmem:[%s335_s23] sm:$0xf] %vm2122_vm10, %v2118_v6  ;;  %v2094_v35 = vmax.f32 %v2091_v32, %v2092_v33 }
 0x222   : > { %1929 = vrot.lane.b32.xlu1 %v1918_v7, %s2939_s28  ;;  %1973 = vrot.lane.b32.xlu0 %v1958_v11, %s2939_s28  ;;  %v2095_v36 = vmax.f32 %v2093_v34, %v2094_v35 }
 0x226   : > { %1977 = vrot.lane.b32.xlu1 %v1966_v9, %s2939_s28 }
 0x22a   : > { %1927 = vrot.lane.b32.xlu1 %v1914_v12, %s2939_s28 }
 0x22e   : > { %1975 = vrot.lane.b32.xlu1 %v1962_v17, %s2939_s28 }
 0x252   : > { %2096 = vmax.xlane.f32.xlu1 %v2095_v36 }
 0x28c   : > { %v1972_v41 = vpop.permute.xlu0 %1971 }
 0x290   : > { %v1924_v20 = vpop.permute.xlu1 %1923  ;;  %v1926_v52 = vpop.permute.xlu0 %1925 }
 0x291   : > { %v1934_v48 = vsel %vm1931_vm12, %v1924_v20, %v1926_v52 }
 0x294   : > { %v1930_v22 = vpop.permute.xlu1 %1929  ;;  %v1974_v58 = vpop.permute.xlu0 %1973 }
 0x295   : > { %v1935_v45 = vsel %vm1931_vm12, %v1930_v22, %v1924_v20  ;;  %v1981_v61 = vsel %vm1931_vm12, %v1972_v41, %v1974_v58 }
 0x296   : > { %v1945_v26 = vsel %vm1897_vm14, %v1944_v42, %v1935_v45 }
 0x297   : > { %v2000_v49 = vcombine.low %v1945_v26, %v1934_v48 }
 0x298   : > { %v1978_v40 = vpop.permute.xlu1 %1977 }
 0x299   : > { %v1982_v39 = vsel %vm1931_vm12, %v1978_v40, %v1972_v41  ;;  %v2008_v56 = vrot.slane %v2000_v49, %v3651_v38 }
 0x29a   : > { %v1992_v62 = vsel %vm1897_vm14, %v1991_v55, %v1982_v39 }
 0x29b   : > { %v2024_v51 = vcombine.low %v1992_v62, %v1981_v61 }
 0x29c   : > { %v1928_v43 = vpop.permute.xlu1 %1927 }
 0x29d   : > { %v1932_v46 = vsel %vm1931_vm12, %v1928_v43, %v1930_v22  ;;  %v1933_v47 = vsel %vm1931_vm12, %v1926_v52, %v1928_v43  ;;  %v2032_v4 = vrot.slane %v2024_v51, %v3651_v38 }
 0x29e   : > { %v2001_v53 = vcombine.low %v1933_v47, %v1932_v46 }
 0x2a0   : > { %v1976_v54 = vpop.permute.xlu1 %1975  ;;  %v2015_v57 = vrot.slane %v2001_v53, %v3651_v38 }
 0x2a1   : > { %v1979_v59 = vsel %vm1931_vm12, %v1976_v54, %v1978_v40  ;;  %v1980_v60 = vsel %vm1931_vm12, %v1974_v58, %v1976_v54 }
 0x2a2   : > { %v2016_v1 = vcombine.low %v2008_v56, %v2015_v57  ;;  %v2025_v3 = vcombine.low %v1980_v60, %v1979_v59 }
 0x2a4   : > { %v2039_v16 = vrot.slane %v2025_v3, %v3651_v38  ;;  %v2017_v5 = vrot.slane %v2016_v1, 7 }
 0x2a6   : > { %v2040_v6 = vcombine.low %v2032_v4, %v2039_v16  ;;  %v2019_v8 = vsub.f32 %v3656_v63, %v2017_v5 }
 0x2a8   : > { %v2042_v7 = vadd.f32 %v2040_v6, %v3659_v2 }
 0x2aa   : > { %v2044_v50 = vrot.slane %v2042_v7, 7 }
 0x2ac   : > { %v2046_v9 = vmul.f32 %v2044_v50, %v2019_v8 }
 0x2ae   : > { %v2051_v11 = vrot.slane %v2046_v9, %v3137_v13  ;;  %v2055_v12 = vrot.slane %v2046_v9, %v3145_v15  ;;  %v2059_v14 = vrot.slane %v2046_v9, %v1913_v10  ;;  %v2063_v17 = vrot.slane %v2046_v9, %v1917_v0 }
 0x2b0   : > { %v2069_v38 = vsel %vm2068_vm8, %v2051_v11, 0.0  ;;  %v2070_v18 = vsel %vm2068_vm8, %v2055_v12, 0.0  ;;  %v2072_v2 = vsel %vm2068_vm8, %v2059_v14, 0.0  ;;  %v2074_v24 = vsel %vm2068_vm8, %v2063_v17, 0.0 }
 0x2b1   : > { %v2071_v23 = vadd.f32 %v2070_v18, %v2069_v38 }
 0x2b3   : > { %v2073_v63 = vadd.f32 %v2072_v2, %v2071_v23 }
 0x2b5   : > { %v2075_v27 = vadd.f32 %v2074_v24, %v2073_v63 }
 0x2b7   : > { %2076 = vadd.xlane.f32.xlu0 %v2075_v27 }
 0x2bb   : > { %2108 = vmax.xlane.f32.xlu0 %v2107_v19 }
 0x2df   : > { %v2097_v15 = vpop.xlane.xlu1 %2096 }
 0x2e0   : > { %2099 = vst.msk [vmem:[#allocation3 - $0x1] sm:$0x2] %vm2098_vm9, %v2097_v15 }
 0x344   : > { %v2077_v10 = vpop.xlane.xlu0 %2076 }
 0x345   : > { %v2078_v28 = vmul.f32 0.5, %v2077_v10 }
 0x347   : > { %v2084_v0 = vrot.slane %v2078_v28, %v3137_v13 }
 0x348   : > { %v2109_v29 = vpop.xlane.xlu0 %2108 }
 0x349   : > { %v2086_v30 = vadd.f32 %v2084_v0, %v2079_v44  ;;  %2110 = vst.msk [vmem:[#allocation4] sm:$0x1] %vm2087_vm11, %v2109_v29 }
 0x34b   : > { %2088 = vst.msk [vmem:[#allocation7] sm:$0x1] %vm2087_vm11, %v2086_v30 }
 0x34c PF: > { %p3732_p13 = scmp.eq.s32.totalorder %s2266_s3, 3  ;;  %s2940_s23 = smov [#allocation7]  }
 0x34d   : > { %s2149_s24 = sshll.u32 %s2940_s23, 4  ;;  %s2150_s24 = int_to_ptr.vmem [resolvable:$true] %s2149_s24 }
 0x34e   : > { %s2862_s25 = scalar_lea.vmem %s2150_s24, 16  ;;  %s2868_s26 = scalar_lea.vmem %s2150_s24, 32 }
 0x34f   : > { %p2863_p0 = scmp.ne.s32.totalorder %s2150_s24, %s2862_s25  ;;  %p2869_p3 = scmp.lt.s32.totalorder %s2150_s24, %s2150_s24 }
 0x350   : > { %p2870_p4 = scmp.lt.s32.totalorder %s2868_s26, %s2862_s25 }
 0x351   : > { %p2864_p1 = pnand %p2863_p0, %p3732_p13 }
 0x352   : > { %p2871_p5 = por %p2870_p4, %p2869_p3 }
 0x353   : > { %p2865_p2 = pneg %p2864_p1 }
 0x355   : > { %p2872_p6 = pnand %p2871_p5, %p2865_p2 }
 0x357   : > { %2875 = shalt.err (!%p2872_p6)
}
 0x358   : > { %s2876_s29 = scalar_lea.hbm %s3778_s5, 16 }
 0x359   : > { %p2877_p7 = scmp.ne.s32.totalorder %s3778_s5, %s2876_s29  ;;  %p2882_p10 = scmp.lt.u32.totalorder %s2876_s29, %s3778_s5 }
 0x35b   : > { %p2878_p8 = pnand %p2877_p7, %p3732_p13 }
 0x35d   : > { %p2879_p9 = pneg %p2878_p8 }
 0x35f   : > { %p2884_p11 = pnand %p2882_p10, %p2879_p9 }
 0x361   : > { %2887 = shalt.err (!%p2884_p11)
}
 0x362   : > { %2805 = dma.vmem_to_hbm [thread:$0]  (%p3732_p13), %s2150_s24, 16, %s3778_s5, [#allocation8]  }
 0x363   : > { %2909 = dma.done.wait (%p3732_p13), [#allocation8], 16  }
 0x364   : > { %2911 = vsyncadd (%p3732_p13), [#allocation8], 4294967280 }
 0x365 PF: > { %s21_s9 = sadd.s32 1, %s2930_s9   ;;  %s3782_s28 = smov %s2922_s30 }
 0x366   : > { %p18_p12 = scmp.ge.s32.totalorder %s21_s9, 6   ;;  %s3783_s29 = smov %s2926_s8 }
 0x367   : > { %s3784_s30 = smov %s3787_s4  ;;  %s3785_s8 = smov %s3791_s10 }
 0x368   :  { %20 = sbr.rel (!%p18_p12) target bundleno = 6 (0x6), region = 109 }
 0x36f   :  { %2184 = vsyncpa [#allocation8], 1 }
 0x370   :  { %2186 = vsyncpa [#allocation8 + $0x1], 1 }

</bundles_post_ra>
